<compile_context>
chip_gen: v5e
topology: v5e:2x2
jax: 0.10.0
libtpu: 0.0.40
codegen_flags: <defaults>
</compile_context>

<pallas_src>
import functools
import math

import jax
import jax.numpy as jnp
from jax.experimental import pallas as pl
from jax.experimental.pallas import tpu as pltpu


def _qlinear_hqq_kernel(x_ref, qw_ref, scales_ref, zeros_ref, bias_ref, out_ref,
                        acc_ref, *, bits, groupsize):
    """One (m, n, k) grid step: dequantize a (tk, tn) weight tile, accumulate."""
    k = pl.program_id(2)

    @pl.when(k == 0)
    def _():
        acc_ref[...] = jnp.zeros_like(acc_ref)

    qw = qw_ref[...]                                  # (KPt, tn) int32 packed rows
    kpt, _ = qw.shape
    S = 32 // bits                                    # values packed per int32
    mask = (1 << bits) - 1
    gS = groupsize // S                               # packed rows per quant group

    # Per-group affine params for this k tile, expanded to one row per packed
    # row (computed once, outside the shift loop).
    scales = scales_ref[...].astype(jnp.float32)      # (Gt, tn)
    zeros = zeros_ref[...].astype(jnp.float32)        # (Gt, tn)
    scale_z = scales * zeros
    scales_rep = jnp.repeat(scales, gS, axis=0)       # (KPt, tn)
    sz_rep = jnp.repeat(scale_z, gS, axis=0)          # (KPt, tn)

    # Static loop over the S shift values: 2-D (KPt, tn) slices only.
    # Slice s holds original K rows {packed_row*S + s}; the wrapper permutes
    # x's K axis to this shift-major order so plain sublane concatenation of
    # the slices yields a weight tile consistent with the x tile.
    w_slices = []
    for s in range(S):
        # jnp.right_shift on int32 is arithmetic, but the & mask strips any
        # sign-extension bits (same as the torch reference).
        w_int = jnp.bitwise_and(jnp.right_shift(qw, s * bits), mask)    # (KPt, tn)
        w = scales_rep * w_int.astype(jnp.float32) - sz_rep             # (KPt, tn) f32
        w_slices.append(w.astype(jnp.bfloat16))
    w_tile = jnp.concatenate(w_slices, axis=0)        # (tk, tn) bf16, shift-major rows

    x = x_ref[...].astype(jnp.bfloat16)               # (tm, tk), shift-major K order
    acc_ref[...] += jnp.dot(x, w_tile, preferred_element_type=jnp.float32)

    @pl.when(k == pl.num_programs(2) - 1)
    def _():
        out = acc_ref[...] + bias_ref[...].astype(jnp.float32)
        out_ref[...] = out.astype(out_ref.dtype)


def _pick_tile(dim, desired, align):
    """Largest t <= desired with t % align == 0 and dim % t == 0; else dim (full)."""
    if dim <= desired:
        return dim
    t = (desired // align) * align
    while t >= align:
        if dim % t == 0:
            return t
        t -= align
    return dim


def quant_linear_hqq(x, qweight, scales, qzeros, bias, *, bits, groupsize,
                     block_m=256, block_n=256, block_k=1024):
    """Forward of QuantLinearHQQ: x @ dequant(qweight, scales, qzeros) + bias."""
    if bits not in (2, 4, 8):
        # TODO(synk): general_unpack_on_row path for bits in {3,5,6,7} not implemented.
        raise NotImplementedError("Only 2/4/8-bit packing supported in this kernel.")

    orig_shape = x.shape
    K = orig_shape[-1]
    KP, N = qweight.shape
    S = 32 // bits
    if groupsize == -1:
        groupsize = K
    G = scales.shape[0]
    assert KP * S == K, (KP, S, K)
    assert G * groupsize == K, (G, groupsize, K)
    assert groupsize % S == 0, "groupsize must be a multiple of 32//bits"

    x2 = x.reshape(-1, K)
    M = x2.shape[0]

    # ---- tile selection (blocks obey the (8, 128)/full-dim rules) ----
    tm = _pick_tile(M, block_m, 8)
    tn = _pick_tile(N, block_n, 128)
    # tk: multiple of groupsize, of 128 (lane dim of x block), keeps the packed
    # weight block (tk*bits/32 rows) and the scales block (tk/groupsize rows)
    # 8-sublane aligned.  Falls back to full K if K has no such divisor.
    k_align = math.lcm(8 * groupsize, 256 // bits, 128)
    tk = _pick_tile(K, block_k, k_align)

    kpt = tk * bits // 32          # packed-weight rows per k tile
    gt = tk // groupsize           # quant groups per k tile

    # Permute x's K axis: within each k tile, reorder from packed-interleaved
    # (packed_row*S + shift) to shift-major (shift*KPt + packed_row) so the
    # kernel can unpack with contiguous 2-D slices (no sublane interleave).
    x_perm = x2.reshape(M, K // tk, tk // S, S).swapaxes(2, 3).reshape(M, K)

    if bias is None:
        bias = jnp.zeros((N,), dtype=x.dtype)
    bias2 = bias.reshape(1, N)

    kernel = functools.partial(_qlinear_hqq_kernel, bits=bits, groupsize=groupsize)

    flops = 2 * M * K * N
    bytes_accessed = int(
        x2.size * x2.dtype.itemsize
        + qweight.size * qweight.dtype.itemsize
        + scales.size * scales.dtype.itemsize
        + qzeros.size * qzeros.dtype.itemsize
        + bias2.size * bias2.dtype.itemsize
        + M * N * jnp.dtype(x.dtype).itemsize
    )

    out = pl.pallas_call(
        kernel,
        out_shape=jax.ShapeDtypeStruct((M, N), x.dtype),
        grid_spec=pltpu.PrefetchScalarGridSpec(
            num_scalar_prefetch=0,
            grid=(M // tm, N // tn, K // tk),
            in_specs=[
                pl.BlockSpec((tm, tk), lambda m, n, k: (m, k)),    # activations (permuted K)
                pl.BlockSpec((kpt, tn), lambda m, n, k: (k, n)),   # packed weights
                pl.BlockSpec((gt, tn), lambda m, n, k: (k, n)),    # scales
                pl.BlockSpec((gt, tn), lambda m, n, k: (k, n)),    # zero-points (float, HQQ)
                pl.BlockSpec((1, tn), lambda m, n, k: (0, n)),     # bias
            ],
            # k-independent output block => f32 accumulator stays resident.
            out_specs=pl.BlockSpec((tm, tn), lambda m, n, k: (m, n)),
            scratch_shapes=[pltpu.VMEM((tm, tn), jnp.float32)],
        ),
        compiler_params=pltpu.CompilerParams(
            # m/n shard across megacore TCs; k is the reduction axis.
            dimension_semantics=("parallel", "parallel", "arbitrary"),
            # NOTE: for very large tiles (tn=512 / big tm prefill) raise
            # vmem_limit_bytes here; current tiles fit the default budget.
        ),
        cost_estimate=pl.CostEstimate(
            flops=flops, transcendentals=0, bytes_accessed=bytes_accessed),
    )(x_perm, qweight, scales, qzeros, bias2)
    return out.reshape(orig_shape[:-1] + (N,))


def _reference(x, qweight, scales, qzeros, bias, bits, groupsize):
    """Pure-JAX port of DequantAndUnpack + matmul (for verification)."""
    KP, N = qweight.shape
    S = 32 // bits
    shifts = (jnp.arange(S, dtype=jnp.int32) * bits)[None, :, None]
    w = jnp.bitwise_and(jnp.right_shift(qweight[:, None, :], shifts), (1 << bits) - 1)
    w = w.reshape(KP * S, N).astype(jnp.float32)
    G = scales.shape[0]
    w = w.reshape(G, groupsize, N)
    w = scales[:, None, :] * w - (qzeros * scales)[:, None, :]
    w = w.reshape(KP * S, N)
    # Match the kernel's bf16 MXU inputs (accumulation in f32).
    x2 = x.reshape(-1, x.shape[-1]).astype(jnp.bfloat16).astype(jnp.float32)
    w16 = w.astype(jnp.bfloat16).astype(jnp.float32)
    out = x2 @ w16 + bias
    return out.reshape(x.shape[:-1] + (N,))


if __name__ == "__main__":
    bits = 4
    infeatures = 512
    outfeatures = 512
    groupsize = 32
    batch, seq = 2, 8

    key = jax.random.PRNGKey(0)
    k_x, k_qw, k_s, k_z, k_b = jax.random.split(key, 5)

    # Deterministic synthetic "quantized" parameters (module __init__ shapes).
    x = jax.random.normal(k_x, (batch, seq, infeatures), dtype=jnp.float32)
    qweight = jax.lax.bitcast_convert_type(
        jax.random.bits(k_qw, (infeatures // 32 * bits, outfeatures), dtype=jnp.uint32),
        jnp.int32)
    n_groups = math.ceil(infeatures / groupsize)
    scales = jax.random.uniform(k_s, (n_groups, outfeatures),
                                dtype=jnp.float32, minval=0.005, maxval=0.02)
    qzeros = jax.random.uniform(k_z, (n_groups, outfeatures),
                                dtype=jnp.float32, minval=0.0, maxval=15.0)
    bias = jax.random.normal(k_b, (outfeatures,), dtype=jnp.float32)

    # block_k=256 exercises the K-reduction grid axis + accumulator at small K.
    out = quant_linear_hqq(x, qweight, scales, qzeros, bias,
                           bits=bits, groupsize=groupsize, block_k=256)
    out = jax.block_until_ready(out)

    ref = _reference(x, qweight, scales, qzeros, bias, bits, groupsize)
    assert out.shape == (batch, seq, outfeatures), out.shape
    err = float(jnp.max(jnp.abs(out - ref)))
    assert jnp.allclose(out, ref, rtol=1e-2, atol=1e-2), err

    print("KERNEL_OK")
</pallas_src>

<mosaic_0001>
module attributes {stable_mosaic.version = 11 : i64} {
  func.func @_qlinear_hqq_kernel(%arg0: i32, %arg1: i32, %arg2: i32, %arg3: memref<16x256xf32, #tpu.memory_space<vmem>>, %arg4: memref<32x256xi32, #tpu.memory_space<vmem>>, %arg5: memref<8x256xf32, #tpu.memory_space<vmem>>, %arg6: memref<8x256xf32, #tpu.memory_space<vmem>>, %arg7: memref<1x256xf32, #tpu.memory_space<vmem>>, %arg8: memref<16x256xf32, #tpu.memory_space<vmem>>, %arg9: memref<16x256xf32, #tpu.memory_space<vmem>>) attributes {dimension_semantics = [#tpu.dimension_semantics<parallel>, #tpu.dimension_semantics<parallel>, #tpu.dimension_semantics<arbitrary>], iteration_bounds = array<i64: 1, 2, 2>, scalar_prefetch = 0 : i64, scratch_operands = 1 : i64, tpu.core_type = #tpu.core_type<tc>, window_params = [{transform_indices = @transform_0, window_bounds = array<i64: 16, 256>}, {transform_indices = @transform_1, window_bounds = array<i64: 32, 256>}, {transform_indices = @transform_2, window_bounds = array<i64: 8, 256>}, {transform_indices = @transform_3, window_bounds = array<i64: 8, 256>}, {transform_indices = @transform_4, window_bounds = array<i64: 1, 256>}, {transform_indices = @transform_5, window_bounds = array<i64: 16, 256>}]} {
    %c0_i32 = arith.constant 0 : i32
    %0 = arith.cmpi eq, %arg2, %c0_i32 : i32
    %1 = arith.extui %0 : i1 to i32
    %c0_i32_0 = arith.constant 0 : i32
    %2 = arith.cmpi ne, %1, %c0_i32_0 : i32
    scf.if %2 {
      %cst_21 = arith.constant 0.000000e+00 : f32
      %87 = vector.broadcast %cst_21 : f32 to vector<16x256xf32>
      %c0_22 = arith.constant 0 : index
      %c0_23 = arith.constant 0 : index
      %88 = vector.load %arg9[%c0_22, %c0_23] : memref<16x256xf32, #tpu.memory_space<vmem>>, vector<16x256xf32>
      tpu.vector_store %arg9[%c0_22, %c0_23], %87 {strides = array<i32>} : memref<16x256xf32, #tpu.memory_space<vmem>>, vector<16x256xf32>,
    } else {
    }
    %c0 = arith.constant 0 : index
    %c0_1 = arith.constant 0 : index
    %3 = vector.load %arg4[%c0, %c0_1] : memref<32x256xi32, #tpu.memory_space<vmem>>, vector<32x256xi32>
    %c0_2 = arith.constant 0 : index
    %c0_3 = arith.constant 0 : index
    %4 = vector.load %arg5[%c0_2, %c0_3] : memref<8x256xf32, #tpu.memory_space<vmem>>, vector<8x256xf32>
    %c0_4 = arith.constant 0 : index
    %c0_5 = arith.constant 0 : index
    %5 = vector.load %arg6[%c0_4, %c0_5] : memref<8x256xf32, #tpu.memory_space<vmem>>, vector<8x256xf32>
    %6 = arith.mulf %4, %5 : vector<8x256xf32>
    %7 = vector.shape_cast %4 : vector<8x256xf32> to vector<8x1x256xf32>
    %8 = vector.broadcast %7 : vector<8x1x256xf32> to vector<8x4x256xf32>
    %9 = vector.shape_cast %8 : vector<8x4x256xf32> to vector<32x256xf32>
    %10 = vector.shape_cast %6 : vector<8x256xf32> to vector<8x1x256xf32>
    %11 = vector.broadcast %10 : vector<8x1x256xf32> to vector<8x4x256xf32>
    %12 = vector.shape_cast %11 : vector<8x4x256xf32> to vector<32x256xf32>
    %c0_i32_6 = arith.constant 0 : i32
    %13 = vector.broadcast %c0_i32_6 : i32 to vector<32x256xi32>
    %14 = arith.shrsi %3, %13 : vector<32x256xi32>
    %c15_i32 = arith.constant 15 : i32
    %15 = vector.broadcast %c15_i32 : i32 to vector<32x256xi32>
    %16 = arith.andi %14, %15 : vector<32x256xi32>
    %17 = arith.sitofp %16 : vector<32x256xi32> to vector<32x256xf32>
    %18 = arith.mulf %9, %17 : vector<32x256xf32>
    %19 = arith.subf %18, %12 : vector<32x256xf32>
    %20 = arith.truncf %19 : vector<32x256xf32> to vector<32x256xbf16>
    %c4_i32 = arith.constant 4 : i32
    %21 = vector.broadcast %c4_i32 : i32 to vector<32x256xi32>
    %22 = arith.shrsi %3, %21 : vector<32x256xi32>
    %c15_i32_7 = arith.constant 15 : i32
    %23 = vector.broadcast %c15_i32_7 : i32 to vector<32x256xi32>
    %24 = arith.andi %22, %23 : vector<32x256xi32>
    %25 = arith.sitofp %24 : vector<32x256xi32> to vector<32x256xf32>
    %26 = arith.mulf %9, %25 : vector<32x256xf32>
    %27 = arith.subf %26, %12 : vector<32x256xf32>
    %28 = arith.truncf %27 : vector<32x256xf32> to vector<32x256xbf16>
    %c8_i32 = arith.constant 8 : i32
    %29 = vector.broadcast %c8_i32 : i32 to vector<32x256xi32>
    %30 = arith.shrsi %3, %29 : vector<32x256xi32>
    %c15_i32_8 = arith.constant 15 : i32
    %31 = vector.broadcast %c15_i32_8 : i32 to vector<32x256xi32>
    %32 = arith.andi %30, %31 : vector<32x256xi32>
    %33 = arith.sitofp %32 : vector<32x256xi32> to vector<32x256xf32>
    %34 = arith.mulf %9, %33 : vector<32x256xf32>
    %35 = arith.subf %34, %12 : vector<32x256xf32>
    %36 = arith.truncf %35 : vector<32x256xf32> to vector<32x256xbf16>
    %c12_i32 = arith.constant 12 : i32
    %37 = vector.broadcast %c12_i32 : i32 to vector<32x256xi32>
    %38 = arith.shrsi %3, %37 : vector<32x256xi32>
    %c15_i32_9 = arith.constant 15 : i32
    %39 = vector.broadcast %c15_i32_9 : i32 to vector<32x256xi32>
    %40 = arith.andi %38, %39 : vector<32x256xi32>
    %41 = arith.sitofp %40 : vector<32x256xi32> to vector<32x256xf32>
    %42 = arith.mulf %9, %41 : vector<32x256xf32>
    %43 = arith.subf %42, %12 : vector<32x256xf32>
    %44 = arith.truncf %43 : vector<32x256xf32> to vector<32x256xbf16>
    %c16_i32 = arith.constant 16 : i32
    %45 = vector.broadcast %c16_i32 : i32 to vector<32x256xi32>
    %46 = arith.shrsi %3, %45 : vector<32x256xi32>
    %c15_i32_10 = arith.constant 15 : i32
    %47 = vector.broadcast %c15_i32_10 : i32 to vector<32x256xi32>
    %48 = arith.andi %46, %47 : vector<32x256xi32>
    %49 = arith.sitofp %48 : vector<32x256xi32> to vector<32x256xf32>
    %50 = arith.mulf %9, %49 : vector<32x256xf32>
    %51 = arith.subf %50, %12 : vector<32x256xf32>
    %52 = arith.truncf %51 : vector<32x256xf32> to vector<32x256xbf16>
    %c20_i32 = arith.constant 20 : i32
    %53 = vector.broadcast %c20_i32 : i32 to vector<32x256xi32>
    %54 = arith.shrsi %3, %53 : vector<32x256xi32>
    %c15_i32_11 = arith.constant 15 : i32
    %55 = vector.broadcast %c15_i32_11 : i32 to vector<32x256xi32>
    %56 = arith.andi %54, %55 : vector<32x256xi32>
    %57 = arith.sitofp %56 : vector<32x256xi32> to vector<32x256xf32>
    %58 = arith.mulf %9, %57 : vector<32x256xf32>
    %59 = arith.subf %58, %12 : vector<32x256xf32>
    %60 = arith.truncf %59 : vector<32x256xf32> to vector<32x256xbf16>
    %c24_i32 = arith.constant 24 : i32
    %61 = vector.broadcast %c24_i32 : i32 to vector<32x256xi32>
    %62 = arith.shrsi %3, %61 : vector<32x256xi32>
    %c15_i32_12 = arith.constant 15 : i32
    %63 = vector.broadcast %c15_i32_12 : i32 to vector<32x256xi32>
    %64 = arith.andi %62, %63 : vector<32x256xi32>
    %65 = arith.sitofp %64 : vector<32x256xi32> to vector<32x256xf32>
    %66 = arith.mulf %9, %65 : vector<32x256xf32>
    %67 = arith.subf %66, %12 : vector<32x256xf32>
    %68 = arith.truncf %67 : vector<32x256xf32> to vector<32x256xbf16>
    %c28_i32 = arith.constant 28 : i32
    %69 = vector.broadcast %c28_i32 : i32 to vector<32x256xi32>
    %70 = arith.shrsi %3, %69 : vector<32x256xi32>
    %c15_i32_13 = arith.constant 15 : i32
    %71 = vector.broadcast %c15_i32_13 : i32 to vector<32x256xi32>
    %72 = arith.andi %70, %71 : vector<32x256xi32>
    %73 = arith.sitofp %72 : vector<32x256xi32> to vector<32x256xf32>
    %74 = arith.mulf %9, %73 : vector<32x256xf32>
    %75 = arith.subf %74, %12 : vector<32x256xf32>
    %76 = arith.truncf %75 : vector<32x256xf32> to vector<32x256xbf16>
    %77 = tpu.concatenate %20, %28, %36, %44, %52, %60, %68, %76 in 0 : vector<32x256xbf16>, vector<32x256xbf16>, vector<32x256xbf16>, vector<32x256xbf16>, vector<32x256xbf16>, vector<32x256xbf16>, vector<32x256xbf16>, vector<32x256xbf16> -> vector<256x256xbf16>
    %c0_14 = arith.constant 0 : index
    %c0_15 = arith.constant 0 : index
    %78 = vector.load %arg3[%c0_14, %c0_15] : memref<16x256xf32, #tpu.memory_space<vmem>>, vector<16x256xf32>
    %79 = arith.truncf %78 : vector<16x256xf32> to vector<16x256xbf16>
    %c0_16 = arith.constant 0 : index
    %c0_17 = arith.constant 0 : index
    %80 = vector.load %arg9[%c0_16, %c0_17] : memref<16x256xf32, #tpu.memory_space<vmem>>, vector<16x256xf32>
    %cst = arith.constant dense<0.000000e+00> : vector<16x256xf32>
    %81 = tpu.matmul %79, %77, %cst {dimension_numbers = #tpu.dot_dimension_numbers<[1], [0], [0], [1], [0, 0, 1, 1], [], []>} : vector<16x256xbf16>, vector<256x256xbf16>, vector<16x256xf32> -> vector<16x256xf32>
    %82 = arith.addf %80, %81 : vector<16x256xf32>
    %c0_18 = arith.constant 0 : index
    %c0_19 = arith.constant 0 : index
    %83 = vector.load %arg9[%c0_18, %c0_19] : memref<16x256xf32, #tpu.memory_space<vmem>>, vector<16x256xf32>
    tpu.vector_store %arg9[%c0_18, %c0_19], %82 {strides = array<i32>} : memref<16x256xf32, #tpu.memory_space<vmem>>, vector<16x256xf32>,
    %c1_i32 = arith.constant 1 : i32
    %84 = arith.cmpi eq, %arg2, %c1_i32 : i32
    %85 = arith.extui %84 : i1 to i32
    %c0_i32_20 = arith.constant 0 : i32
    %86 = arith.cmpi ne, %85, %c0_i32_20 : i32
    scf.if %86 {
      %c0_21 = arith.constant 0 : index
      %c0_22 = arith.constant 0 : index
      %87 = vector.load %arg9[%c0_21, %c0_22] : memref<16x256xf32, #tpu.memory_space<vmem>>, vector<16x256xf32>
      %c0_23 = arith.constant 0 : index
      %c0_24 = arith.constant 0 : index
      %88 = vector.load %arg7[%c0_23, %c0_24] : memref<1x256xf32, #tpu.memory_space<vmem>>, vector<1x256xf32>
      %89 = vector.broadcast %88 : vector<1x256xf32> to vector<16x256xf32>
      %90 = arith.addf %87, %89 : vector<16x256xf32>
      %c0_25 = arith.constant 0 : index
      %c0_26 = arith.constant 0 : index
      %91 = vector.load %arg8[%c0_25, %c0_26] : memref<16x256xf32, #tpu.memory_space<vmem>>, vector<16x256xf32>
      tpu.vector_store %arg8[%c0_25, %c0_26], %90 {strides = array<i32>} : memref<16x256xf32, #tpu.memory_space<vmem>>, vector<16x256xf32>,
    } else {
    }
    return
  }
  func.func @transform_0(%arg0: i32, %arg1: i32, %arg2: i32) -> (i32, i32) {
    %c0_i32 = arith.constant 0 : i32
    return %arg0, %arg2 : i32, i32
  }
  func.func @transform_1(%arg0: i32, %arg1: i32, %arg2: i32) -> (i32, i32) {
    %c0_i32 = arith.constant 0 : i32
    return %arg2, %arg1 : i32, i32
  }
  func.func @transform_2(%arg0: i32, %arg1: i32, %arg2: i32) -> (i32, i32) {
    %c0_i32 = arith.constant 0 : i32
    return %arg2, %arg1 : i32, i32
  }
  func.func @transform_3(%arg0: i32, %arg1: i32, %arg2: i32) -> (i32, i32) {
    %c0_i32 = arith.constant 0 : i32
    return %arg2, %arg1 : i32, i32
  }
  func.func @transform_4(%arg0: i32, %arg1: i32, %arg2: i32) -> (i32, i32) {
    %c0_i32 = arith.constant 0 : i32
    %c0_i32_0 = arith.constant 0 : i32
    return %c0_i32, %arg1 : i32, i32
  }
  func.func @transform_5(%arg0: i32, %arg1: i32, %arg2: i32) -> (i32, i32) {
    %c0_i32 = arith.constant 0 : i32
    return %arg0, %arg1 : i32, i32
  }
}

</mosaic_0001>

<bundles_post_ra>
// kernel: tpu_custom_call.1
= control target key start
LH: loop header
LB: loop body
LE: loop exit
PB: predicated region body
PF: predicated region fallthrough
CT: control target
= control target key end

     0   :  { %s3505_s0 = inlined_call_operand.hbm [shape: f32[16,512], index: 0, kind: input, shape index: {}]   ;;  %s3506_s1 = inlined_call_operand.hbm [shape: s32[64,512], index: 1, kind: input, shape index: {}]   ;;  %s3507_s2 = inlined_call_operand.hbm [shape: f32[16,512], index: 2, kind: input, shape index: {}]   ;;  %s3508_s3 = inlined_call_operand.hbm [shape: f32[16,512], index: 3, kind: input, shape index: {}]   ;;  %s3509_s4 = inlined_call_operand.hbm [shape: f32[1,512], index: 4, kind: input, shape index: {}]   ;;  %s3510_s5 = inlined_call_operand.hbm [shape: f32[16,512], index: 5, kind: output, shape index: {}]  }
   0x1   :  { %3524 = sst [smem:[#allocation45_spill]] %s3505_s0 }
   0x2   :  { %3525 = sst [smem:[#allocation46_spill]] %s3506_s1 }
   0x3   :  { %3526 = sst [smem:[#allocation47_spill]] %s3507_s2 }
   0x4   :  { %3527 = sst [smem:[#allocation48_spill]] %s3508_s3 }
   0x5   :  { %3528 = sst [smem:[#allocation49_spill]] %s3509_s4 }
   0x6   :  { %3529 = sst [smem:[#allocation50_spill]] %s3510_s5 }
   0x7   :  { %10 = vsyncpa [#allocation4], 0 }
   0x8   :  { %12 = vsyncpa [#allocation4 + $0x1], 0 }
   0x9   :  { %13 = vsyncpa [#allocation7], 0 }
   0xa   :  { %15 = vsyncpa [#allocation7 + $0x1], 0 }
   0xb   :  { %16 = vsyncpa [#allocation10], 0 }
   0xc   :  { %18 = vsyncpa [#allocation10 + $0x1], 0 }
   0xd   :  { %19 = vsyncpa [#allocation5], 0 }
   0xe   :  { %21 = vsyncpa [#allocation5 + $0x1], 0  ;;  %s2517_s18 = smov 0   ;;  %s2519_s19 = smov 0  }
   0xf   :  { %s2521_s20 = smov 0   ;;  %s2523_s21 = smov 0  }
  0x10   :  { %s2525_s22 = smov 0   ;;  %s2527_s23 = smov 0  }
  0x11   :  { %s2529_s24 = smov 0   ;;  %s2531_s25 = smov 0  }
  0x12   :  { %s2533_s26 = smov 0   ;;  %s2535_s27 = smov 0  }
  0x13   :  { %s2537_s28 = smov 0   ;;  %s2539_s29 = smov 0  }
  0x14   :  { %s2541_s30 = smov 0   ;;  %s2543_s6 = smov 0  }
  0x15 LB: > { %3530 = sst [smem:[#allocation18_spill]] %s2426_s18  ;;  %s39_s7 = sadd.s32 1, %s2470_s29  ;;  %s2478_s6 = sphi %s2543_s6, %s27_s6   ;;  %s2474_s30 = sphi %s2541_s30, %s3614_s30   ;;  %s2470_s29 = sphi %s2539_s29, %s3613_s29   ;;  %s2466_s28 = sphi %s2537_s28, %s3624_s28   ;;  %s2462_s27 = sphi %s2535_s27, %s3611_s27   ;;  %s2458_s26 = sphi %s2533_s26, %s3623_s26   ;;  %s2454_s25 = sphi %s2531_s25, %s3622_s25   ;;  %s2450_s24 = sphi %s2529_s24, %s3621_s24   ;;  %s2446_s23 = sphi %s2527_s23, %s3620_s23   ;;  %s2442_s22 = sphi %s2525_s22, %s3619_s22   ;;  %s2438_s21 = sphi %s2523_s21, %s3618_s21   ;;  %s2434_s20 = sphi %s2521_s20, %s3617_s20   ;;  %s2430_s19 = sphi %s2519_s19, %s3616_s19   ;;  %s2426_s18 = sphi %s2517_s18, %s3615_s18  }
  0x16   : > { %3531 = sst [smem:[#allocation19_spill]] %s2438_s21  ;;  %s42_s8 = sadd.s32 1, %s2474_s30 }
  0x17   : > { %3532 = sst [smem:[#allocation20_spill]] %s2446_s23  ;;  %p40_p0 = scmp.ge.s32.totalorder %s39_s7, 2 }
  0x18   : > { %3533 = sst [smem:[#allocation21_spill]] %s2462_s27  ;;  %p63_p1 = scmp.eq.s32.totalorder %s2478_s6, 0 }
  0x19   : > { %3534 = sst [smem:[#allocation22_spill]] %s2466_s28  ;;  %p90_p2 = scmp.ne.s32.totalorder %s2446_s23, %s2442_s22 }
  0x1a   : > { %3535 = sst [smem:[#allocation23_spill]] %s2470_s29  ;;  %s3626_s7 = smov (%p40_p0, %s39_s7), 0 }
  0x1b   : > { %3536 = sst [smem:[#allocation24_spill]] %s2474_s30  ;;  %s3628_s8 = smov (!%p40_p0, %s42_s8), %s2474_s30 }
  0x1c   : > { %3537 = sst [smem:[#allocation25_spill]] %s3626_s7  ;;  %s2600_s10 = ssub.s32 %s2470_s29, %s3626_s7 }
  0x1d   : > { %p2604_p3 = por %p90_p2, %p63_p1  ;;  %p53_p4 = scmp.eq.s32.totalorder %s2600_s10, 0 }
  0x1e   : > { %p96_p5 = scmp.ne.s32.totalorder %s2442_s22, %s2438_s21  ;;  %p2049_p6 = scmp.lt.s32.totalorder %s2478_s6, 4 }
  0x1f   : > { %s3515_s12 = sshll.u32 %s2470_s29, 4  ;;  %s257_s14 = sand.u32 1, %s2446_s23  }
  0x20   : > { %s1977_s15 = sshll.u32 %s257_s14, 6  ;;  %s2616_s16 = sshll.u32 %s2474_s30, 1 }
  0x21   : > { %s265_s17 = sadd.s32 %s3515_s12, %s2616_s16  ;;  %s259_s9 = scalar_lea.vmem [#allocation6], %s1977_s15 }
  0x22   : > { %s270_s7 = sshll.u32 %s259_s9, 4  ;;  %s1981_s5 = sshll.u32 %s265_s17, 3  ;;  %s271_s7 = int_to_ptr.vmem [resolvable:$true] %s270_s7 }
  0x23   : > { %s3539_s1 = sld [smem:[#allocation46_spill]]  ;;  %p2628_p7 = pnand %p2049_p6, %p2604_p3 }
  0x24   : > { %p1992_p8 = scmp.ge.s32.totalorder %s2478_s6, 1  ;;  %s3541_s15 = sand.u32 1, %s2478_s6  }
  0x25   : > { %s2635_s12 = scalar_lea.sflag [#allocation7], %s3541_s15  ;;  %s3516_s9 = smov 512  }
  0x26   : > { %s3517_s17 = smov 256   ;;  %s3518_s18 = smov 16  }
  0x27   : > { %p341_p9 = scmp.lt.s32.totalorder %s2478_s6, 5  ;;  %s3544_s2 = sld [smem:[#allocation47_spill]] }
  0x28   : > { %s3545_s3 = sld [smem:[#allocation48_spill]]  ;;  %p62_p11 = scmp.ne.s32.totalorder %s2458_s26, %s2454_s25 }
  0x29   : > { %s267_s4 = scalar_lea.hbm %s3539_s1, %s1981_s5  ;;  %s1984_s5 = sshll.u32 %s2470_s29, 2 }
  0x2a   : > { %s268_s23 = sshll.u32 %s267_s4, 4  ;;  %s2644_s4 = sshll.u32 %s257_s14, 4  ;;  %s269_s23 = int_to_ptr.hbm [resolvable:$true] %s268_s23 }
  0x2b   : > { %2035 = dma.hbm_to_vmem [thread:$0]  (!%p2628_p7), %s269_s23, 1024, %s271_s7, %s2635_s12, %s3516_s9, %s3517_s17, %s3518_s18  }
  0x2c   : > { %p2647_p10 = pnand %p1992_p8, %p341_p9  ;;  %s289_s28 = sadd.s32 %s1984_s5, %s2616_s16 }
  0x2d   : > { %s1985_s23 = sshll.u32 %s289_s28, 3  ;;  %s306_s18 = scalar_lea.vmem [#allocation9], %s2644_s4 }
  0x2e   : > { %s3542_s27 = scalar_select %p2647_p10, 1, 0 }
  0x2f   : > { %s291_s14 = scalar_lea.hbm %s3544_s2, %s1985_s23  ;;  %s313_s17 = scalar_lea.hbm %s3545_s3, %s1985_s23 }
  0x30   : > { %3543 = sst [smem:[#allocation26_spill]] %s3542_s27  ;;  %s317_s1 = sshll.u32 %s306_s18, 4  ;;  %s318_s1 = int_to_ptr.vmem [resolvable:$true] %s317_s1 }
  0x31   : > { %s315_s30 = sshll.u32 %s313_s17, 4  ;;  %s3546_s27 = sand.u32 1, %s2478_s6   ;;  %s316_s30 = int_to_ptr.hbm [resolvable:$true] %s315_s30 }
  0x32   : > { %s2661_s21 = scalar_lea.sflag [#allocation10], %s3546_s27  ;;  %s55_s5 = sadd.s32 1, %s2458_s26 }
  0x33   : > { %2041 = dma.hbm_to_vmem [thread:$0]  (!%p2628_p7), %s316_s30, 256, %s318_s1, %s2661_s21  }
  0x34   : > { %s2670_s28 = scalar_select %p53_p4, %s2458_s26, %s55_s5  }
  0x35   : > { %p68_p12 = scmp.ne.s32.totalorder %s2454_s25, %s2450_s24  ;;  %s230_s9 = sand.u32 1, %s2458_s26  }
  0x36   : > { %s3547_s23 = sshll.u32 %s2470_s29, 4  ;;  %s3548_s0 = sld [smem:[#allocation45_spill]] }
  0x37   : > { %p64_p13 = por %p63_p1, %p62_p11  ;;  %s1974_s27 = sshll.u32 %s230_s9, 5 }
  0x38   : > { %s234_s30 = scalar_lea.vmem [#allocation3], %s1974_s27  ;;  %s293_s15 = sshll.u32 %s291_s14, 4  ;;  %s294_s15 = int_to_ptr.hbm [resolvable:$true] %s293_s15 }
  0x39   : > { %s245_s11 = sshll.u32 %s234_s30, 4  ;;  %p2030_p0 = pnand %p2049_p6, %p64_p13  ;;  %s246_s11 = int_to_ptr.vmem [resolvable:$true] %s245_s11 }
  0x3a   : > { %s231_s18 = scalar_lea.sflag [#allocation4], %s230_s9  ;;  %s3551_s17 = smov 16  }
  0x3b   : > { %s284_s27 = scalar_lea.vmem [#allocation8], %s2644_s4  ;;  %s3554_s2 = sld [smem:[#allocation18_spill]] }
  0x3c   : > { %s242_s7 = scalar_lea.hbm %s3548_s0, %s3547_s23  ;;  %s3550_s23 = sld [smem:[#allocation24_spill]] }
  0x3d   : > { %s243_s1 = sshll.u32 %s242_s7, 4  ;;  %s3552_s7 = smov 256   ;;  %s244_s1 = int_to_ptr.hbm [resolvable:$true] %s243_s1 }
  0x3e   : > { %s3553_s0 = smov 512   ;;  %s295_s30 = sshll.u32 %s284_s27, 4  ;;  %s296_s30 = int_to_ptr.vmem [resolvable:$true] %s295_s30 }
  0x3f   : > { %2032 = dma.hbm_to_vmem [thread:$0]  (!%p2030_p0), %s244_s1, 512, %s246_s11, %s231_s18, %s3553_s0, %s3552_s7, %s3551_s17  }
  0x40   : > { %2038 = dma.hbm_to_vmem [thread:$0]  (!%p2628_p7), %s294_s15, 256, %s296_s30, %s2635_s12  }
  0x41   : > { %s2694_s14 = sadd.s32 4294967295, %s2478_s6   ;;  %s3555_s9 = sld [smem:[#allocation20_spill]] }
  0x42   : > { %s1971_s3 = sadd.s32 4294967294, %s2478_s6   ;;  %p44_p2 = scmp.ge.s32.totalorder %s3628_s8, 2 }
  0x43   : > { %p69_p3 = scmp.eq.s32.totalorder %s2694_s14, 0  ;;  %s165_s0 = sadd.s32 1, %s2434_s20 }
  0x44   : > { %p172_p4 = scmp.ne.s32.totalorder %s2434_s20, %s2430_s19  ;;  %s3630_s8 = smov (%p44_p2, %s3628_s8), 0 }
  0x45   : > { %3556 = sst [smem:[#allocation27_spill]] %s3630_s8  ;;  %p2710_p7 = por %p69_p3, %p68_p12 }
  0x46   : > { %p2719_p8 = por %p96_p5, %p69_p3  ;;  %s79_s4 = ssub.s32 %s3550_s23, %s3630_s8 }
  0x47   : > { %p2730_p9 = por %p172_p4, %p63_p1  ;;  %s80_s24 = sor.u32 %s79_s4, %s2600_s10 }
  0x48   : > { %p163_p11 = scmp.eq.s32.totalorder %s79_s4, 0  ;;  %p81_p12 = scmp.eq.s32.totalorder %s80_s24, 0 }
  0x49   : > { %p178_p13 = scmp.ne.s32.totalorder %s2430_s19, %s3554_s2  ;;  %s3560_s15 = sadd.s32 1, %s3555_s9 }
  0x4a   : > { %s2738_s11 = scalar_select %p163_p11, %s2434_s20, %s165_s0  }
  0x4b   : > { %s3632_s9 = smov (!%p81_p12, %s3555_s9), %s3560_s15  ;;  %p2747_p5 = por %p178_p13, %p69_p3 }
  0x4c   : > { %p204_p1 = scmp.eq.s32.totalorder %s2694_s14, 3  ;;  %p210_p0 = scmp.eq.s32.totalorder %s1971_s3, 3 }
  0x4d   : > { %s326_s23 = sand.u32 1, %s2434_s20   ;;  %s3564_s27 = sld [smem:[#allocation49_spill]] }
  0x4e   : > { %p2756_p2 = por %p204_p1, %p172_p4  ;;  %s1990_s2 = sshll.u32 %s326_s23, 1 }
  0x4f   : > { %p2760_p11 = por %p210_p0, %p178_p13  ;;  %s328_s0 = scalar_lea.vmem [#allocation11], %s1990_s2 }
  0x50   : > { %s336_s4 = sshll.u32 %s328_s0, 4  ;;  %p2042_p3 = pnand %p2049_p6, %p2730_p9  ;;  %s337_s4 = int_to_ptr.vmem [resolvable:$true] %s336_s4 }
  0x51   : > { %345 = sbr.rel (%p2647_p10) target bundleno = 517 (0x205), region = 40 }
  0x53   : > { %s332_s30 = scalar_lea.hbm %s3564_s27, %s2616_s16 }
  0x54   : > { %s334_s24 = sshll.u32 %s332_s30, 4  ;;  %s335_s24 = int_to_ptr.hbm [resolvable:$true] %s334_s24 }
  0x55   : > { %2044 = dma.hbm_to_vmem [thread:$0]  (!%p2042_p3), %s335_s24, 32, %s337_s4, %s2661_s21  }
  0x56   : > { %s347_s15 = sand.u32 1, %s2454_s25  }
  0x57   : > { %s1993_s23 = sshll.u32 %s347_s15, 5  ;;  %s348_s8 = scalar_lea.sflag [#allocation4], %s347_s15 }
  0x58   : > { %s2776_s29 = scalar_lea.vmem [#allocation3], %s1993_s23 }
  0x59   : > { %2405 = dma.done.wait (%p2710_p7), %s348_s8, 512  }
  0x5a   : > { %2407 = vsyncadd (%p2710_p7), %s348_s8, 4294966784  ;;  %s357_s16 = sand.u32 1, %s2694_s14   ;;  %s359_s21 = sand.u32 1, %s2442_s22  }
  0x5b   : > { %s1994_s1 = sshll.u32 %s359_s21, 6  ;;  %s358_s2 = scalar_lea.sflag [#allocation7], %s357_s16 }
  0x5c   : > { %s2784_s17 = scalar_lea.vmem [#allocation6], %s1994_s1 }
  0x5d   : > { %2409 = dma.done.wait (%p2719_p8), %s358_s2, 1280  }
  0x5e   : > { %2411 = vsyncadd (%p2719_p8), %s358_s2, 4294966016  ;;  %s2790_s7 = sshll.u32 %s359_s21, 4  ;;  %s378_s12 = scalar_lea.sflag [#allocation10], %s357_s16 }
  0x5f   : > { %s371_s8 = scalar_lea.vmem [#allocation8], %s2790_s7  ;;  %s381_s27 = scalar_lea.vmem [#allocation9], %s2790_s7 }
  0x60   : > { %2413 = dma.done.wait (%p2719_p8), %s378_s12, 256  }
  0x61   : > { %2415 = vsyncadd (%p2719_p8), %s378_s12, 4294967040  ;;  %s2799_s14 = sand.u32 1, %s2430_s19  }
  0x62   : > { %s1997_s30 = sshll.u32 %s2799_s14, 1 }
  0x63   : > { %s2802_s0 = scalar_lea.vmem [#allocation11], %s1997_s30 }
  0x64   : > { %2417 = dma.done.wait (%p2747_p5), %s378_s12, 32  }
  0x65   : > { %2419 = vsyncadd (%p2747_p5), %s378_s12, 4294967264  ;;  %s1998_s4 = sshll.u32 %s2799_s14, 5  ;;  %s3566_s3 = sld [smem:[#allocation21_spill]] }
  0x66   : > { %s2809_s24 = scalar_lea.vmem [#allocation12], %s1998_s4 }
  0x6b   : > { %p1999_p6 = scmp.ne.s32.totalorder %s3566_s3, 0 }
  0x6d   : > { %451 = sbr.rel (%p1999_p6) target bundleno = 119 (0x77), region = 64 }
  0x72   : > { %v2483_v0 = vmov 0.0  }
  0x73   : > { %452 = vst [vmem:[#allocation2 + $0x10] sm:$0xff] %v2483_v0 }
  0x74   : > { %453 = vst [vmem:[#allocation2] sm:$0xff] %v2483_v0 }
  0x75   : > { %454 = vst [vmem:[#allocation2 + $0x18] sm:$0xff] %v2483_v0 }
  0x76   : > { %455 = vst [vmem:[#allocation2 + $0x8] sm:$0xff] %v2483_v0 }
  0x77 PF: > { %v2813_v1 = vld [vmem:[%s2784_s17 + $0x20] sm:$0xff]  ;;  %v2816_v2 = vld [vmem:[%s2784_s17 + $0x28] sm:$0xff]  ;;  %v2819_v3 = vld [vmem:[%s2784_s17 + $0x30] sm:$0xff]  ;;  %vm484_vm0 = vcmask 1044484   ;;  %vm487_vm1 = vcmask 1045509   ;;  %vm490_vm2 = vcmask 1046534  }
  0x78   : > { %v2822_v4 = vld [vmem:[%s2784_s17 + $0x38] sm:$0xff]  ;;  %v2824_v5 = vld [vmem:[%s371_s8] sm:$0xff]  ;;  %vm493_vm3 = vcmask 1046528   ;;  %v599_v7 = vand.u32 15, %v2813_v1  ;;  %vm520_vm4 = vcmask 1043456   ;;  %v600_v11 = vand.u32 15, %v2816_v2 }
  0x79   : > { %v465_v6 = vld [vmem:[%s371_s8 + $0x8] sm:$0xff]  ;;  %v466_v8 = vld [vmem:[%s381_s27] sm:$0xff]  ;;  %v601_v12 = vand.u32 15, %v2819_v3  ;;  %v602_v13 = vand.u32 15, %v2822_v4  ;;  %v706_v17 = vshra.s32 %v2813_v1, 4  ;;  %vm473_vm5 = vcmask 1040384  }
  0x7a   : > { %v467_v9 = vld [vmem:[%s381_s27 + $0x8] sm:$0xff]  ;;  %v2827_v10 = vrot.slane %v465_v6, 7  ;;  %v2833_v14 = vmul.f32 %v466_v8, %v2824_v5  ;;  %v607_v16 = vcvt.s32.f32 %v599_v7  ;;  %v608_v27 = vcvt.s32.f32 %v600_v11 }
  0x7b   : > { %v469_v15 = vmul.f32 %v467_v9, %v465_v6  ;;  %v609_v28 = vcvt.s32.f32 %v601_v12  ;;  %v610_v29 = vcvt.s32.f32 %v602_v13  ;;  %v707_v9 = vshra.s32 %v2816_v2, 4 }
  0x7c   : > { %v485_v18 = vsel %vm484_vm0, %v2824_v5, %v2827_v10  ;;  %v488_v19 = vsel %vm487_vm1, %v2824_v5, %v2827_v10  ;;  %v491_v20 = vsel %vm490_vm2, %v2824_v5, %v2827_v10  ;;  %v494_v21 = vsel %vm493_vm3, %v2827_v10, %v2824_v5 }
  0x7d   : > { %v486_v22 = vrot.slane %v485_v18, 4  ;;  %v489_v23 = vrot.slane %v488_v19, 5  ;;  %v492_v24 = vrot.slane %v491_v20, 6  ;;  %v495_v25 = vrot.slane %v494_v21, 7 }
  0x7e   : > { %v2848_v26 = vrot.slane %v469_v15, 7  ;;  %v621_v0 = vrot.slane %v608_v27, 4  ;;  %v622_v6 = vrot.slane %v610_v29, 4  ;;  %v708_v11 = vshra.s32 %v2819_v3, 4 }
  0x7f   : > { %v504_v30 = vperm.slane %v486_v22, 0  ;;  %v505_v31 = vperm.slane %v486_v22, 1  ;;  %v506_v32 = vperm.slane %v489_v23, 0  ;;  %v507_v33 = vperm.slane %v489_v23, 1 }
  0x80   : > { %v508_v34 = vperm.slane %v492_v24, 0  ;;  %v509_v35 = vperm.slane %v492_v24, 1  ;;  %v510_v36 = vperm.slane %v495_v25, 0  ;;  %v511_v37 = vperm.slane %v495_v25, 1 }
  0x81   : > { %v516_v38 = vrot.slane %v505_v31, 4  ;;  %v517_v39 = vrot.slane %v507_v33, 4  ;;  %v547_v40 = vsel %vm484_vm0, %v2833_v14, %v2848_v26  ;;  %v549_v41 = vsel %vm487_vm1, %v2833_v14, %v2848_v26 }
  0x82   : > { %v518_v42 = vrot.slane %v509_v35, 4  ;;  %v519_v43 = vrot.slane %v511_v37, 4  ;;  %v548_v44 = vrot.slane %v547_v40, 4  ;;  %v550_v45 = vrot.slane %v549_v41, 5 }
  0x83   : > { %v2857_v46 = vsel %vm520_vm4, %v504_v30, %v516_v38  ;;  %v2860_v47 = vsel %vm520_vm4, %v506_v32, %v517_v39  ;;  %v551_v48 = vsel %vm490_vm2, %v2833_v14, %v2848_v26  ;;  %v553_v49 = vsel %vm493_vm3, %v2848_v26, %v2833_v14 }
  0x84   : > { %v2869_v50 = vsel %vm520_vm4, %v508_v34, %v518_v42  ;;  %v2872_v51 = vsel %vm520_vm4, %v510_v36, %v519_v43  ;;  %v552_v52 = vrot.slane %v551_v48, 6  ;;  %v554_v53 = vrot.slane %v553_v49, 7 }
  0x85   : > { %v563_v54 = vperm.slane %v548_v44, 0  ;;  %v564_v55 = vperm.slane %v548_v44, 1  ;;  %v565_v56 = vperm.slane %v550_v45, 0  ;;  %v566_v57 = vperm.slane %v550_v45, 1 }
  0x86   : > { %v567_v58 = vperm.slane %v552_v52, 0  ;;  %v568_v59 = vperm.slane %v552_v52, 1  ;;  %v569_v60 = vperm.slane %v554_v53, 0  ;;  %v570_v61 = vperm.slane %v554_v53, 1 }
  0x87   : > { %v575_v62 = vrot.slane %v564_v55, 4  ;;  %v576_v63 = vrot.slane %v566_v57, 4  ;;  %v629_v15 = vsel %vm520_vm4, %v607_v16, %v621_v0  ;;  %v630_v18 = vsel %vm520_vm4, %v621_v0, %v607_v16 }
  0x88   : > { %v577_v7 = vrot.slane %v568_v59, 4  ;;  %v578_v8 = vrot.slane %v570_v61, 4  ;;  %v631_v21 = vrot.slane %v630_v18, 4  ;;  %v632_v22 = vsel %vm520_vm4, %v609_v28, %v622_v6 }
  0x89   : > { %v2877_v12 = vsel %vm520_vm4, %v563_v54, %v575_v62  ;;  %v2880_v13 = vsel %vm520_vm4, %v565_v56, %v576_v63  ;;  %v633_v23 = vsel %vm520_vm4, %v622_v6, %v609_v28  ;;  %v647_v24 = vmul.f32 %v629_v15, %v2857_v46 }
  0x8a   : > { %v2885_v19 = vsel %vm520_vm4, %v567_v58, %v577_v7  ;;  %v2888_v20 = vsel %vm520_vm4, %v569_v60, %v578_v8  ;;  %v649_v25 = vmul.f32 %v632_v22, %v2869_v50  ;;  %v709_v27 = vshra.s32 %v2822_v4, 4 }
  0x8b   : > { %v634_v29 = vrot.slane %v633_v23, 4  ;;  %v648_v16 = vmul.f32 %v631_v21, %v2860_v47  ;;  %v714_v30 = vand.u32 15, %v706_v17  ;;  %v715_v31 = vand.u32 15, %v707_v9 }
  0x8c   : > { %v655_v32 = vsub.f32 %v647_v24, %v2877_v12  ;;  %v657_v33 = vsub.f32 %v649_v25, %v2885_v19  ;;  %v716_v34 = vand.u32 15, %v708_v11  ;;  %v717_v35 = vand.u32 15, %v709_v27 }
  0x8d   : > { %v650_v28 = vmul.f32 %v634_v29, %v2872_v51  ;;  %v656_v36 = vsub.f32 %v648_v16, %v2880_v13  ;;  %v722_v37 = vcvt.s32.f32 %v714_v30  ;;  %v723_v38 = vcvt.s32.f32 %v715_v31 }
  0x8e   : > { %675 = vst [vmem:[#allocation1 + $0x20] ss:$2 sm:$0xff] %v655_v32  ;;  %v724_v39 = vcvt.s32.f32 %v716_v34  ;;  %v725_v40 = vcvt.s32.f32 %v717_v35  ;;  %v821_v41 = vshra.s32 %v2813_v1, 8  ;;  %v822_v17 = vshra.s32 %v2816_v2, 8 }
  0x8f   : > { %v658_v42 = vsub.f32 %v650_v28, %v2888_v20  ;;  %677 = vst [vmem:[#allocation1 + $0x21] ss:$2 sm:$0xff] %v656_v36  ;;  %v736_v43 = vrot.slane %v723_v38, 4  ;;  %v823_v44 = vshra.s32 %v2819_v3, 8  ;;  %v824_v45 = vshra.s32 %v2822_v4, 8 }
  0x90   : > { %679 = vst [vmem:[#allocation1 + $0x30] ss:$2 sm:$0xff] %v657_v33  ;;  %v737_v48 = vrot.slane %v725_v40, 4  ;;  %v829_v49 = vand.u32 15, %v821_v41  ;;  %v830_v52 = vand.u32 15, %v822_v17  ;;  %v936_v9 = vshra.s32 %v2813_v1, 12 }
  0x91   : > { %681 = vst [vmem:[#allocation1 + $0x31] ss:$2 sm:$0xff] %v658_v42  ;;  %v744_v53 = vsel %vm520_vm4, %v722_v37, %v736_v43  ;;  %v745_v54 = vsel %vm520_vm4, %v736_v43, %v722_v37  ;;  %v831_v55 = vand.u32 15, %v823_v44  ;;  %v832_v56 = vand.u32 15, %v824_v45 }
  0x92   : > { %v746_v57 = vrot.slane %v745_v54, 4  ;;  %v747_v58 = vsel %vm520_vm4, %v724_v39, %v737_v48  ;;  %v748_v59 = vsel %vm520_vm4, %v737_v48, %v724_v39  ;;  %v762_v60 = vmul.f32 %v744_v53, %v2857_v46 }
  0x93   : > { %v749_v61 = vrot.slane %v748_v59, 4  ;;  %v764_v62 = vmul.f32 %v747_v58, %v2869_v50  ;;  %v837_v63 = vcvt.s32.f32 %v829_v49  ;;  %v838_v0 = vcvt.s32.f32 %v830_v52 }
  0x94   : > { %v763_v6 = vmul.f32 %v746_v57, %v2860_v47  ;;  %v770_v7 = vsub.f32 %v762_v60, %v2877_v12  ;;  %v840_v8 = vcvt.s32.f32 %v832_v56  ;;  %v839_v15 = vcvt.s32.f32 %v831_v55 }
  0x95   : > { %v765_v11 = vmul.f32 %v749_v61, %v2872_v51  ;;  %v851_v18 = vrot.slane %v838_v0, 4  ;;  %v937_v21 = vshra.s32 %v2816_v2, 12  ;;  %v772_v25 = vsub.f32 %v764_v62, %v2885_v19 }
  0x96   : > { %v2918_v22 = vld.sshfl [vmem:[#allocation1 + $0x20] sm:$0xff pattern:$0x75316420]  ;;  %v2920_v23 = vld.sshfl [vmem:[#allocation1 + $0x28] sm:$0xff pattern:$0x75316420]  ;;  %v771_v24 = vsub.f32 %v763_v6, %v2880_v13 }
  0x97   : > { %3567 = vst [vmem:[#allocation28_spill] sm:$0xff] %v2920_v23  ;;  %v773_v27 = vsub.f32 %v765_v11, %v2888_v20  ;;  %v852_v29 = vrot.slane %v840_v8, 4  ;;  %v859_v16 = vsel %vm520_vm4, %v837_v63, %v851_v18  ;;  %v860_v30 = vsel %vm520_vm4, %v851_v18, %v837_v63 }
  0x98   : > { %790 = vst [vmem:[#allocation1 + $0x20] ss:$2 sm:$0xff] %v770_v7  ;;  %v2927_v31 = vld.sshfl [vmem:[#allocation1 + $0x30] sm:$0xff pattern:$0x75316420]  ;;  %v877_v33 = vmul.f32 %v859_v16, %v2857_v46  ;;  %v861_v34 = vrot.slane %v860_v30, 4 }
  0x99   : > { %3568 = vst [vmem:[#allocation29_spill] sm:$0xff] %v2927_v31  ;;  %v2929_v32 = vld.sshfl [vmem:[#allocation1 + $0x38] sm:$0xff pattern:$0x75316420]  ;;  %v862_v35 = vsel %vm520_vm4, %v839_v15, %v852_v29  ;;  %v863_v28 = vsel %vm520_vm4, %v852_v29, %v839_v15  ;;  %v938_v36 = vshra.s32 %v2819_v3, 12  ;;  %v939_v38 = vshra.s32 %v2822_v4, 12 }
  0x9a   : > { %3569 = vst [vmem:[#allocation30_spill] sm:$0xff] %v2929_v32  ;;  %v864_v37 = vrot.slane %v863_v28, 4  ;;  %v878_v39 = vmul.f32 %v861_v34, %v2860_v47  ;;  %v944_v40 = vand.u32 15, %v936_v9  ;;  %v945_v41 = vand.u32 15, %v937_v21 }
  0x9b   : > { %792 = vst [vmem:[#allocation1 + $0x21] ss:$2 sm:$0xff] %v771_v24  ;;  %v946_v17 = vand.u32 15, %v938_v36  ;;  %v879_v42 = vmul.f32 %v862_v35, %v2869_v50  ;;  %v947_v44 = vand.u32 15, %v939_v38  ;;  %v1051_v45 = vshra.s32 %v2813_v1, 16 }
  0x9c   : > { %794 = vst [vmem:[#allocation1 + $0x30] ss:$2 sm:$0xff] %v772_v25  ;;  %v880_v43 = vmul.f32 %v864_v37, %v2872_v51  ;;  %v885_v48 = vsub.f32 %v877_v33, %v2877_v12  ;;  %v886_v49 = vsub.f32 %v878_v39, %v2880_v13  ;;  %v952_v52 = vcvt.s32.f32 %v944_v40 }
  0x9d   : > { %796 = vst [vmem:[#allocation1 + $0x31] ss:$2 sm:$0xff] %v773_v27  ;;  %v953_v53 = vcvt.s32.f32 %v945_v41  ;;  %v954_v54 = vcvt.s32.f32 %v946_v17  ;;  %v955_v55 = vcvt.s32.f32 %v947_v44  ;;  %v1052_v56 = vshra.s32 %v2816_v2, 16 }
  0x9e   : > { %v1053_v57 = vshra.s32 %v2819_v3, 16  ;;  %v1054_v59 = vshra.s32 %v2822_v4, 16  ;;  %v1059_v60 = vand.u32 15, %v1051_v45  ;;  %v1166_v61 = vshra.s32 %v2813_v1, 20 }
  0x9f   : > { %v966_v58 = vrot.slane %v953_v53, 4  ;;  %v887_v0 = vsub.f32 %v879_v42, %v2885_v19  ;;  %v888_v6 = vsub.f32 %v880_v43, %v2888_v20  ;;  %v967_v7 = vrot.slane %v955_v55, 4 }
  0xa0   : > { %v1060_v11 = vand.u32 15, %v1052_v56  ;;  %v1061_v29 = vand.u32 15, %v1053_v57  ;;  %v1062_v30 = vand.u32 15, %v1054_v59  ;;  %v1067_v33 = vcvt.s32.f32 %v1059_v60 }
  0xa1   : > { %v974_v8 = vsel %vm520_vm4, %v952_v52, %v966_v58  ;;  %v975_v9 = vsel %vm520_vm4, %v966_v58, %v952_v52  ;;  %v977_v25 = vsel %vm520_vm4, %v954_v54, %v967_v7  ;;  %v978_v27 = vsel %vm520_vm4, %v967_v7, %v954_v54 }
  0xa2   : > { %v2946_v62 = vld.sshfl [vmem:[#allocation1 + $0x20] sm:$0xff pattern:$0x75316420]  ;;  %v2948_v63 = vld.sshfl [vmem:[#allocation1 + $0x28] sm:$0xff pattern:$0x75316420]  ;;  %v992_v21 = vmul.f32 %v974_v8, %v2857_v46  ;;  %v994_v35 = vmul.f32 %v977_v25, %v2869_v50  ;;  %v1068_v28 = vcvt.s32.f32 %v1060_v11  ;;  %v1069_v38 = vcvt.s32.f32 %v1061_v29 }
  0xa3   : > { %905 = vst [vmem:[#allocation1 + $0x20] ss:$2 sm:$0xff] %v885_v48  ;;  %v976_v24 = vrot.slane %v975_v9, 4  ;;  %v979_v16 = vrot.slane %v978_v27, 4  ;;  %v1167_v36 = vshra.s32 %v2816_v2, 20  ;;  %v1070_v39 = vcvt.s32.f32 %v1062_v30 }
  0xa4   : > { %v2954_v15 = vld.sshfl [vmem:[#allocation1 + $0x30] sm:$0xff pattern:$0x75316420]  ;;  %v2956_v18 = vld.sshfl [vmem:[#allocation1 + $0x38] sm:$0xff pattern:$0x75316420]  ;;  %v1000_v37 = vsub.f32 %v992_v21, %v2877_v12  ;;  %v1002_v52 = vsub.f32 %v994_v35, %v2885_v19 }
  0xa5   : > { %907 = vst [vmem:[#allocation1 + $0x21] ss:$2 sm:$0xff] %v886_v49  ;;  %v993_v34 = vmul.f32 %v976_v24, %v2860_v47  ;;  %v1168_v40 = vshra.s32 %v2819_v3, 20  ;;  %v995_v41 = vmul.f32 %v979_v16, %v2872_v51  ;;  %v1081_v17 = vrot.slane %v1068_v28, 4 }
  0xa6   : > { %909 = vst [vmem:[#allocation1 + $0x30] ss:$2 sm:$0xff] %v887_v0  ;;  %v1169_v42 = vshra.s32 %v2822_v4, 20  ;;  %v1174_v43 = vand.u32 15, %v1166_v61  ;;  %v1082_v44 = vrot.slane %v1070_v39, 4  ;;  %v1175_v45 = vand.u32 15, %v1167_v36 }
  0xa7   : > { %911 = vst [vmem:[#allocation1 + $0x31] ss:$2 sm:$0xff] %v888_v6  ;;  %v1176_v48 = vand.u32 15, %v1168_v40  ;;  %v1001_v49 = vsub.f32 %v993_v34, %v2880_v13  ;;  %v1090_v53 = vsel %vm520_vm4, %v1081_v17, %v1067_v33  ;;  %v1089_v57 = vsel %vm520_vm4, %v1067_v33, %v1081_v17 }
  0xa8   : > { %v1177_v54 = vand.u32 15, %v1169_v42  ;;  %v1092_v58 = vsel %vm520_vm4, %v1069_v38, %v1082_v44  ;;  %v1093_v59 = vsel %vm520_vm4, %v1082_v44, %v1069_v38  ;;  %v1183_v60 = vcvt.s32.f32 %v1175_v45 }
  0xa9   : > { %v1003_v61 = vsub.f32 %v995_v41, %v2888_v20  ;;  %v1091_v0 = vrot.slane %v1090_v53, 4  ;;  %v1094_v6 = vrot.slane %v1093_v59, 4  ;;  %v1182_v7 = vcvt.s32.f32 %v1174_v43 }
  0xaa   : > { %v1184_v11 = vcvt.s32.f32 %v1176_v48  ;;  %v1185_v21 = vcvt.s32.f32 %v1177_v54  ;;  %v1107_v24 = vmul.f32 %v1089_v57, %v2857_v46  ;;  %v1109_v25 = vmul.f32 %v1092_v58, %v2869_v50 }
  0xab   : > { %v1196_v27 = vrot.slane %v1183_v60, 4  ;;  %v1281_v16 = vshra.s32 %v2813_v1, 24  ;;  %v1282_v30 = vshra.s32 %v2816_v2, 24  ;;  %v1283_v33 = vshra.s32 %v2819_v3, 24 }
  0xac   : > { %v2971_v55 = vld.sshfl [vmem:[#allocation1 + $0x20] sm:$0xff pattern:$0x75316420]  ;;  %v2973_v56 = vld.sshfl [vmem:[#allocation1 + $0x28] sm:$0xff pattern:$0x75316420]  ;;  %v1108_v34 = vmul.f32 %v1091_v0, %v2860_v47  ;;  %v1110_v28 = vmul.f32 %v1094_v6, %v2872_v51  ;;  %v1117_v41 = vsub.f32 %v1109_v25, %v2885_v19 }
  0xad   : > { %1020 = vst [vmem:[#allocation1 + $0x20] ss:$2 sm:$0xff] %v1000_v37  ;;  %v1197_v29 = vrot.slane %v1185_v21, 4  ;;  %v1205_v35 = vsel %vm520_vm4, %v1196_v27, %v1182_v7  ;;  %v1115_v37 = vsub.f32 %v1107_v24, %v2877_v12  ;;  %v1204_v38 = vsel %vm520_vm4, %v1182_v7, %v1196_v27 }
  0xae   : > { %v2979_v8 = vld.sshfl [vmem:[#allocation1 + $0x30] sm:$0xff pattern:$0x75316420]  ;;  %v2981_v9 = vld.sshfl [vmem:[#allocation1 + $0x38] sm:$0xff pattern:$0x75316420]  ;;  %v1116_v44 = vsub.f32 %v1108_v34, %v2880_v13  ;;  %v1118_v54 = vsub.f32 %v1110_v28, %v2888_v20  ;;  %v1222_v57 = vmul.f32 %v1204_v38, %v2857_v46 }
  0xaf   : > { %1022 = vst [vmem:[#allocation1 + $0x21] ss:$2 sm:$0xff] %v1001_v49  ;;  %v1208_v36 = vsel %vm520_vm4, %v1197_v29, %v1184_v11  ;;  %v1284_v39 = vshra.s32 %v2822_v4, 24  ;;  %v1289_v40 = vand.u32 15, %v1281_v16  ;;  %v1206_v17 = vrot.slane %v1205_v35, 4 }
  0xb0   : > { %1024 = vst [vmem:[#allocation1 + $0x30] ss:$2 sm:$0xff] %v1002_v52  ;;  %v1290_v42 = vand.u32 15, %v1282_v30  ;;  %v1291_v43 = vand.u32 15, %v1283_v33  ;;  %v1207_v45 = vsel %vm520_vm4, %v1184_v11, %v1197_v29  ;;  %v1209_v48 = vrot.slane %v1208_v36, 4 }
  0xb1   : > { %1026 = vst [vmem:[#allocation1 + $0x31] ss:$2 sm:$0xff] %v1003_v61  ;;  %v1292_v49 = vand.u32 15, %v1284_v39  ;;  %v1297_v58 = vcvt.s32.f32 %v1289_v40  ;;  %v2004_v6 = vshrl.u32 %v2813_v1, 28  ;;  %v1223_v11 = vmul.f32 %v1206_v17, %v2860_v47 }
  0xb2   : > { %v1298_v59 = vcvt.s32.f32 %v1290_v42  ;;  %v1299_v61 = vcvt.s32.f32 %v1291_v43  ;;  %v1224_v24 = vmul.f32 %v1207_v45, %v2869_v50  ;;  %v2005_v16 = vshrl.u32 %v2816_v2, 28 }
  0xb3   : > { %v1300_v0 = vcvt.s32.f32 %v1292_v49  ;;  %v1225_v30 = vmul.f32 %v1209_v48, %v2872_v51  ;;  %v1230_v33 = vsub.f32 %v1222_v57, %v2877_v12  ;;  %v2006_v1 = vshrl.u32 %v2819_v3, 28 }
  0xb4   : > { %v1311_v27 = vrot.slane %v1298_v59, 4  ;;  %v2007_v34 = vshrl.u32 %v2822_v4, 28  ;;  %v1412_v40 = vcvt.s32.f32 %v2004_v6  ;;  %v1231_v4 = vsub.f32 %v1223_v11, %v2880_v13 }
  0xb5   : > { %v1312_v29 = vrot.slane %v1300_v0, 4  ;;  %v1414_v17 = vcvt.s32.f32 %v2006_v1  ;;  %v1232_v43 = vsub.f32 %v1224_v24, %v2885_v19  ;;  %vm475_vm6 = vcmask 1041409  }
  0xb6   : > { %v1031_v52 = vld.sshfl [vmem:[#allocation1 + $0x20] sm:$0xff pattern:$0x75316420]  ;;  %v1032_v53 = vld.sshfl [vmem:[#allocation1 + $0x28] sm:$0xff pattern:$0x75316420]  ;;  %v1319_v35 = vsel %vm520_vm4, %v1297_v58, %v1311_v27  ;;  %v1320_v28 = vsel %vm520_vm4, %v1311_v27, %v1297_v58  ;;  %v1415_v42 = vcvt.s32.f32 %v2007_v34 }
  0xb7   : > { %v3000_v60 = vpack.c.bf16 %v1032_v53, %v1031_v52  ;;  %1135 = vst [vmem:[#allocation1 + $0x20] ss:$2 sm:$0xff] %v1115_v37  ;;  %v1323_v36 = vsel %vm520_vm4, %v1312_v29, %v1299_v61  ;;  %v1321_v38 = vrot.slane %v1320_v28, 4  ;;  %v1322_v2 = vsel %vm520_vm4, %v1299_v61, %v1312_v29 }
  0xb8   : > { %v1033_v7 = vld.sshfl [vmem:[#allocation1 + $0x30] sm:$0xff pattern:$0x75316420]  ;;  %v1034_v21 = vld.sshfl [vmem:[#allocation1 + $0x38] sm:$0xff pattern:$0x75316420]  ;;  %v3028_v58 = vmul.f32 %v1322_v2, %v2869_v50 }
  0xb9   : > { %v3005_v25 = vpack.c.bf16 %v1034_v21, %v1033_v7  ;;  %1137 = vst [vmem:[#allocation1 + $0x21] ss:$2 sm:$0xff] %v1116_v44  ;;  %v1576_v37 = vunpack.c.h.b16 %v3000_v60  ;;  %v1324_v39 = vrot.slane %v1323_v36, 4  ;;  %v1337_v44 = vmul.f32 %v1319_v35, %v2857_v46 }
  0xba   : > { %1139 = vst [vmem:[#allocation1 + $0x30] ss:$2 sm:$0xff] %v1117_v41  ;;  %v1413_v41 = vcvt.s32.f32 %v2005_v16  ;;  %v1427_v48 = vrot.slane %v1415_v42, 4  ;;  %v1338_v57 = vmul.f32 %v1321_v38, %v2860_v47  ;;  %v474_v16 = vsel %vm473_vm5, %v2824_v5, %v2827_v10 }
  0xbb   : > { %1141 = vst [vmem:[#allocation1 + $0x31] ss:$2 sm:$0xff] %v1118_v54  ;;  %v1578_v3 = vunpack.c.h.b16 %v3005_v25  ;;  %v1233_v54 = vsub.f32 %v1225_v30, %v2888_v20  ;;  %v3031_v59 = vmul.f32 %v1324_v39, %v2872_v51  ;;  %v1345_v24 = vsub.f32 %v1337_v44, %v2877_v12 }
  0xbc   : > { %v1426_v45 = vrot.slane %v1413_v41, 4  ;;  %v1437_v6 = vsel %vm520_vm4, %v1414_v17, %v1427_v48  ;;  %v1438_v7 = vsel %vm520_vm4, %v1427_v48, %v1414_v17  ;;  %vm478_vm7 = vcmask 1042434  }
  0xbd   : > { %v1582_v49 = vpack.c.b16 %v1578_v3, %v1576_v37  ;;  %v3046_v29 = vmul.f32 %v1437_v6, %v2869_v50  ;;  %v476_v50 = vsel %vm475_vm6, %v2824_v5, %v2827_v10  ;;  %v479_v34 = vsel %vm478_vm7, %v2824_v5, %v2827_v10 }
  0xbe   : > { %v1434_v61 = vsel %vm520_vm4, %v1412_v40, %v1426_v45  ;;  %v1435_v0 = vsel %vm520_vm4, %v1426_v45, %v1412_v40  ;;  %v477_v36 = vrot.slane %v476_v50, 1  ;;  %v480_v37 = vrot.slane %v479_v34, 2  ;;  %v3104_v50 = vld [vmem:[%s2784_s17 + $0x8] sm:$0xff]  ;;  %v3107_v34 = vld [vmem:[%s2784_s17 + $0x10] sm:$0xff] }
  0xbf   : > { %v3043_v27 = vmul.f32 %v1434_v61, %v2857_v46  ;;  %1705 = vmatpush.bf16.msra.mxu2 %v1582_v49  ;;  %v1436_v30 = vrot.slane %v1435_v0, 4  ;;  %v1347_v38 = vsub.f32 %v3028_v58, %v2885_v19  ;;  %vm481_vm8 = vcmask 1043459   ;;  %v3094_v61 = vld [vmem:[%s2784_s17] sm:$0xff] }
  0xc0   : > { %v3021_v52 = vld.sshfl [vmem:[#allocation1 + $0x20] sm:$0xff pattern:$0x75316420]  ;;  %v3023_v53 = vld.sshfl [vmem:[#allocation1 + $0x28] sm:$0xff pattern:$0x75316420]  ;;  %v541_v39 = vsel %vm475_vm6, %v2833_v14, %v2848_v26  ;;  %v1346_v40 = vsub.f32 %v1338_v57, %v2880_v13  ;;  %v1348_v57 = vsub.f32 %v3031_v59, %v2888_v20  ;;  %v545_v58 = vsel %vm481_vm8, %v2833_v14, %v2848_v26 }
  0xc1   : > { %3570 = vst [vmem:[#allocation31_spill] sm:$0xff] %v3021_v52  ;;  %v3061_v35 = vmul.f32 %v1436_v30, %v2860_v47  ;;  %v497_v2 = vperm.slane %v474_v16, 1  ;;  %v496_v42 = vperm.slane %v474_v16, 0  ;;  %v499_v3 = vperm.slane %v477_v36, 1 }
  0xc2   : > { %3571 = vst [vmem:[#allocation32_spill] sm:$0xff] %v3023_v53  ;;  %v3037_v21 = vld.sshfl [vmem:[#allocation1 + $0x30] sm:$0xff pattern:$0x75316420]  ;;  %v500_v44 = vperm.slane %v480_v37, 0  ;;  %v542_v48 = vrot.slane %v541_v39, 1 }
  0xc3   : > { %1250 = vst [vmem:[#allocation1 + $0x20] ss:$2 sm:$0xff] %v1230_v33  ;;  %v3039_v11 = vld.sshfl [vmem:[#allocation1 + $0x38] sm:$0xff pattern:$0x75316420]  ;;  %v1439_v33 = vrot.slane %v1438_v7, 4 }
  0xc4   : > { %3572 = vst [vmem:[#allocation33_spill] sm:$0xff] %v3037_v21  ;;  %v512_v45 = vrot.slane %v497_v2, 4  ;;  %v513_v7 = vrot.slane %v499_v3, 4 }
  0xc5   : > { %3573 = vst [vmem:[#allocation34_spill] sm:$0xff] %v3039_v11  ;;  %v3064_v28 = vmul.f32 %v1439_v33, %v2872_v51  ;;  %v482_v51 = vsel %vm481_vm8, %v2824_v5, %v2827_v10  ;;  %v540_v5 = vsel %vm473_vm5, %v2833_v14, %v2848_v26  ;;  %v543_v10 = vsel %vm478_vm7, %v2833_v14, %v2848_v26 }
  0xc6   : > { %1252 = vst [vmem:[#allocation1 + $0x21] ss:$2 sm:$0xff] %v1231_v4  ;;  %v483_v17 = vrot.slane %v482_v51, 3  ;;  %v501_v4 = vperm.slane %v480_v37, 1  ;;  %v3101_v33 = vsel %vm520_vm4, %v496_v42, %v512_v45  ;;  %v546_v37 = vrot.slane %v545_v58, 3 }
  0xc7   : > { %1254 = vst [vmem:[#allocation1 + $0x30] ss:$2 sm:$0xff] %v1232_v43  ;;  %v498_v43 = vperm.slane %v477_v36, 0  ;;  %v544_v36 = vrot.slane %v543_v10, 2  ;;  %v555_v2 = vperm.slane %v540_v5, 0  ;;  %v556_v39 = vperm.slane %v540_v5, 1 }
  0xc8   : > { %1256 = vst [vmem:[#allocation1 + $0x31] ss:$2 sm:$0xff] %v1233_v54  ;;  %v502_v0 = vperm.slane %v483_v17, 0  ;;  %v503_v6 = vperm.slane %v483_v17, 1  ;;  %v514_v16 = vrot.slane %v501_v4, 4  ;;  %v557_v51 = vperm.slane %v542_v48, 0 }
  0xc9   : > { %v3110_v26 = vsel %vm520_vm4, %v498_v43, %v513_v7  ;;  %v3116_v17 = vld [vmem:[%s2784_s17 + $0x18] sm:$0xff]  ;;  %v558_v42 = vperm.slane %v542_v48, 1  ;;  %v559_v3 = vperm.slane %v544_v36, 0  ;;  %v560_v4 = vperm.slane %v544_v36, 1 }
  0xca   : > { %v515_v14 = vrot.slane %v503_v6, 4  ;;  %v561_v43 = vperm.slane %v546_v37, 0  ;;  %v562_v45 = vperm.slane %v546_v37, 1  ;;  %v571_v6 = vrot.slane %v556_v39, 4 }
  0xcb   : > { %v572_v10 = vrot.slane %v558_v42, 4  ;;  %v596_v58 = vand.u32 15, %v3104_v50  ;;  %v597_v5 = vand.u32 15, %v3107_v34 }
  0xcc   : > { %v3125_v7 = vsel %vm520_vm4, %v555_v2, %v571_v6  ;;  %v703_v2 = vshra.s32 %v3104_v50, 4  ;;  %v704_v6 = vshra.s32 %v3107_v34, 4 }
  0xcd   : > { %v3078_v49 = vld.sshfl [vmem:[#allocation1 + $0x20] sm:$0xff pattern:$0x75316420]  ;;  %v3080_v54 = vld.sshfl [vmem:[#allocation1 + $0x28] sm:$0xff pattern:$0x75316420]  ;;  %v604_v36 = vcvt.s32.f32 %v596_v58  ;;  %v605_v37 = vcvt.s32.f32 %v597_v5 }
  0xce   : > { %3574 = vst [vmem:[#allocation35_spill] sm:$0xff] %v3078_v49  ;;  %v818_v58 = vshra.s32 %v3104_v50, 8 }
  0xcf   : > { %3575 = vst [vmem:[#allocation36_spill] sm:$0xff] %v3080_v54  ;;  %v3096_v59 = vld.sshfl [vmem:[#allocation1 + $0x30] sm:$0xff pattern:$0x75316420] }
  0xd0   : > { %1365 = vst [vmem:[#allocation1 + $0x20] ss:$2 sm:$0xff] %v1345_v24  ;;  %v3098_v30 = vld.sshfl [vmem:[#allocation1 + $0x38] sm:$0xff pattern:$0x75316420]  ;;  %v3113_v24 = vsel %vm520_vm4, %v500_v44, %v514_v16  ;;  %v595_v44 = vand.u32 15, %v3094_v61  ;;  %v3129_v16 = vsel %vm520_vm4, %v557_v51, %v572_v10 }
  0xd1   : > { %3576 = vst [vmem:[#allocation37_spill] sm:$0xff] %v3096_v59  ;;  %v817_v51 = vshra.s32 %v3094_v61, 8  ;;  %v1047_v59 = vshra.s32 %v3094_v61, 16 }
  0xd2   : > { %3577 = vst [vmem:[#allocation38_spill] sm:$0xff] %v3098_v30  ;;  %v603_v48 = vcvt.s32.f32 %v595_v44  ;;  %v705_v44 = vshra.s32 %v3116_v17, 4 }
  0xd3   : > { %1367 = vst [vmem:[#allocation1 + $0x21] ss:$2 sm:$0xff] %v1346_v40  ;;  %v3119_v40 = vsel %vm520_vm4, %v502_v0, %v515_v14  ;;  %v598_v0 = vand.u32 15, %v3116_v17 }
  0xd4   : > { %1369 = vst [vmem:[#allocation1 + $0x30] ss:$2 sm:$0xff] %v1347_v38  ;;  %v573_v38 = vrot.slane %v560_v4, 4  ;;  %v702_v4 = vshra.s32 %v3094_v61, 4 }
  0xd5   : > { %1371 = vst [vmem:[#allocation1 + $0x31] ss:$2 sm:$0xff] %v1348_v57  ;;  %v574_v57 = vrot.slane %v562_v45, 4  ;;  %v606_v42 = vcvt.s32.f32 %v598_v0  ;;  %v619_v45 = vrot.slane %v604_v36, 4  ;;  %v713_v0 = vand.u32 15, %v705_v44 }
  0xd6   : > { %v3132_v14 = vsel %vm520_vm4, %v559_v3, %v573_v38  ;;  %v710_v3 = vand.u32 15, %v702_v4  ;;  %v711_v38 = vand.u32 15, %v703_v2 }
  0xd7   : > { %v3135_v39 = vsel %vm520_vm4, %v561_v43, %v574_v57  ;;  %v620_v10 = vrot.slane %v606_v42, 4  ;;  %v623_v43 = vsel %vm520_vm4, %v603_v48, %v619_v45  ;;  %v624_v5 = vsel %vm520_vm4, %v619_v45, %v603_v48 }
  0xd8   : > { %v712_v57 = vand.u32 15, %v704_v6  ;;  %v625_v47 = vrot.slane %v624_v5, 4  ;;  %v643_v41 = vmul.f32 %v623_v43, %v3101_v33  ;;  %v718_v4 = vcvt.s32.f32 %v710_v3 }
  0xd9   : > { %v626_v36 = vsel %vm520_vm4, %v605_v37, %v620_v10  ;;  %v627_v46 = vsel %vm520_vm4, %v620_v10, %v605_v37  ;;  %v719_v2 = vcvt.s32.f32 %v711_v38  ;;  %v721_v48 = vcvt.s32.f32 %v713_v0 }
  0xda   : > { %v628_v1 = vrot.slane %v627_v46, 4  ;;  %v645_v42 = vmul.f32 %v626_v36, %v3113_v24  ;;  %v644_v11 = vmul.f32 %v625_v47, %v3110_v26  ;;  %v651_v21 = vsub.f32 %v643_v41, %v3125_v7 }
  0xdb   : > { %v720_v53 = vcvt.s32.f32 %v712_v57  ;;  %v734_v44 = vrot.slane %v719_v2, 4  ;;  %v819_v37 = vshra.s32 %v3107_v34, 8  ;;  %v735_v46 = vrot.slane %v721_v48, 4 }
  0xdc   : > { %v646_v45 = vmul.f32 %v628_v1, %v3119_v40  ;;  %v653_v6 = vsub.f32 %v645_v42, %v3132_v14  ;;  %v652_v10 = vsub.f32 %v644_v11, %v3129_v16  ;;  %667 = vst [vmem:[#allocation1] ss:$2 sm:$0xff] %v651_v21  ;;  %v820_v3 = vshra.s32 %v3116_v17, 8 }
  0xdd   : > { %v825_v38 = vand.u32 15, %v817_v51  ;;  %v738_v41 = vsel %vm520_vm4, %v718_v4, %v734_v44  ;;  %v739_v43 = vsel %vm520_vm4, %v734_v44, %v718_v4  ;;  %v826_v1 = vand.u32 15, %v818_v58 }
  0xde   : > { %v654_v47 = vsub.f32 %v646_v45, %v3135_v39  ;;  %671 = vst [vmem:[#allocation1 + $0x10] ss:$2 sm:$0xff] %v653_v6  ;;  %v740_v5 = vrot.slane %v739_v43, 4  ;;  %v741_v57 = vsel %vm520_vm4, %v720_v53, %v735_v46  ;;  %v742_v0 = vsel %vm520_vm4, %v735_v46, %v720_v53 }
  0xdf   : > { %669 = vst [vmem:[#allocation1 + $0x1] ss:$2 sm:$0xff] %v652_v10  ;;  %v758_v21 = vmul.f32 %v738_v41, %v3101_v33  ;;  %v743_v11 = vrot.slane %v742_v0, 4  ;;  %v827_v36 = vand.u32 15, %v819_v37  ;;  %v828_v51 = vand.u32 15, %v820_v3 }
  0xe0   : > { %673 = vst [vmem:[#allocation1 + $0x11] ss:$2 sm:$0xff] %v654_v47  ;;  %v759_v42 = vmul.f32 %v740_v5, %v3110_v26  ;;  %v833_v2 = vcvt.s32.f32 %v825_v38  ;;  %v834_v48 = vcvt.s32.f32 %v826_v1  ;;  %v760_v45 = vmul.f32 %v741_v57, %v3113_v24 }
  0xe1   : > { %v766_v58 = vsub.f32 %v758_v21, %v3125_v7  ;;  %v835_v4 = vcvt.s32.f32 %v827_v36  ;;  %v836_v6 = vcvt.s32.f32 %v828_v51  ;;  %v761_v44 = vmul.f32 %v743_v11, %v3119_v40 }
  0xe2   : > { %v849_v10 = vrot.slane %v834_v48, 4  ;;  %v932_v53 = vshra.s32 %v3094_v61, 12  ;;  %v933_v46 = vshra.s32 %v3104_v50, 12  ;;  %v767_v37 = vsub.f32 %v759_v42, %v3129_v16 }
  0xe3   : > { %v850_v3 = vrot.slane %v836_v6, 4  ;;  %v934_v47 = vshra.s32 %v3107_v34, 12  ;;  %v935_v38 = vshra.s32 %v3116_v17, 12  ;;  %v768_v21 = vsub.f32 %v760_v45, %v3132_v14 }
  0xe4   : > { %v853_v41 = vsel %vm520_vm4, %v833_v2, %v849_v10  ;;  %v854_v43 = vsel %vm520_vm4, %v849_v10, %v833_v2  ;;  %v940_v1 = vand.u32 15, %v932_v53  ;;  %v941_v5 = vand.u32 15, %v933_v46 }
  0xe5   : > { %v857_v11 = vsel %vm520_vm4, %v850_v3, %v835_v4  ;;  %v769_v42 = vsub.f32 %v761_v44, %v3135_v39  ;;  %v856_v48 = vsel %vm520_vm4, %v835_v4, %v850_v3  ;;  %v873_v2 = vmul.f32 %v853_v41, %v3101_v33 }
  0xe6   : > { %v3173_v57 = vld.sshfl [vmem:[#allocation1] sm:$0xff pattern:$0x75316420]  ;;  %v3175_v0 = vld.sshfl [vmem:[#allocation1 + $0x8] sm:$0xff pattern:$0x75316420]  ;;  %v949_v6 = vcvt.s32.f32 %v941_v5  ;;  %v948_v52 = vcvt.s32.f32 %v940_v1  ;;  %v875_v44 = vmul.f32 %v856_v48, %v3113_v24 }
  0xe7   : > { %3578 = vst [vmem:[#allocation39_spill] sm:$0xff] %v3173_v57  ;;  %v3179_v36 = vld.sshfl [vmem:[#allocation1 + $0x10] sm:$0xff pattern:$0x75316420]  ;;  %v855_v10 = vrot.slane %v854_v43, 4  ;;  %v858_v53 = vrot.slane %v857_v11, 4 }
  0xe8   : > { %3579 = vst [vmem:[#allocation40_spill] sm:$0xff] %v3175_v0  ;;  %v3181_v51 = vld.sshfl [vmem:[#allocation1 + $0x18] sm:$0xff pattern:$0x75316420]  ;;  %v942_v46 = vand.u32 15, %v934_v47  ;;  %v943_v45 = vand.u32 15, %v935_v38 }
  0xe9   : > { %3580 = vst [vmem:[#allocation41_spill] sm:$0xff] %v3179_v36  ;;  %v964_v30 = vrot.slane %v949_v6, 4  ;;  %v874_v54 = vmul.f32 %v855_v10, %v3110_v26  ;;  %v1048_v4 = vshra.s32 %v3104_v50, 16  ;;  %v876_v47 = vmul.f32 %v858_v53, %v3119_v40 }
  0xea   : > { %3581 = vst [vmem:[#allocation42_spill] sm:$0xff] %v3181_v51  ;;  %v950_v3 = vcvt.s32.f32 %v942_v46  ;;  %v951_v41 = vcvt.s32.f32 %v943_v45  ;;  %v1050_v5 = vshra.s32 %v3116_v17, 16 }
  0xeb   : > { %782 = vst [vmem:[#allocation1] ss:$2 sm:$0xff] %v766_v58  ;;  %v1049_v58 = vshra.s32 %v3107_v34, 16  ;;  %v968_v38 = vsel %vm520_vm4, %v948_v52, %v964_v30  ;;  %v969_v43 = vsel %vm520_vm4, %v964_v30, %v948_v52  ;;  %v1056_v11 = vand.u32 15, %v1048_v4 }
  0xec   : > { %784 = vst [vmem:[#allocation1 + $0x1] ss:$2 sm:$0xff] %v767_v37  ;;  %v881_v37 = vsub.f32 %v873_v2, %v3125_v7  ;;  %v965_v1 = vrot.slane %v951_v41, 4  ;;  %v882_v48 = vsub.f32 %v874_v54, %v3129_v16  ;;  %v970_v10 = vrot.slane %v969_v43, 4 }
  0xed   : > { %786 = vst [vmem:[#allocation1 + $0x10] ss:$2 sm:$0xff] %v768_v21  ;;  %v1055_v21 = vand.u32 15, %v1047_v59  ;;  %v1057_v6 = vand.u32 15, %v1049_v58  ;;  %v1058_v53 = vand.u32 15, %v1050_v5  ;;  %v1162_v2 = vshra.s32 %v3094_v61, 20 }
  0xee   : > { %788 = vst [vmem:[#allocation1 + $0x11] ss:$2 sm:$0xff] %v769_v42  ;;  %v883_v42 = vsub.f32 %v875_v44, %v3132_v14  ;;  %v972_v46 = vsel %vm520_vm4, %v965_v1, %v950_v3  ;;  %v884_v52 = vsub.f32 %v876_v47, %v3135_v39  ;;  %v988_v59 = vmul.f32 %v968_v38, %v3101_v33 }
  0xef   : > { %v1063_v30 = vcvt.s32.f32 %v1055_v21  ;;  %v1064_v4 = vcvt.s32.f32 %v1056_v11  ;;  %v973_v54 = vrot.slane %v972_v46, 4  ;;  %v1066_v44 = vcvt.s32.f32 %v1058_v53 }
  0xf0   : > { %v1163_v41 = vshra.s32 %v3104_v50, 20  ;;  %v1164_v58 = vshra.s32 %v3107_v34, 20  ;;  %v971_v51 = vsel %vm520_vm4, %v950_v3, %v965_v1  ;;  %v1065_v36 = vcvt.s32.f32 %v1057_v6 }
  0xf1   : > { %v1079_v47 = vrot.slane %v1064_v4, 4  ;;  %v1080_v0 = vrot.slane %v1066_v44, 4  ;;  %v1165_v38 = vshra.s32 %v3116_v17, 20  ;;  %v1170_v21 = vand.u32 15, %v1162_v2 }
  0xf2   : > { %v1171_v11 = vand.u32 15, %v1163_v41  ;;  %v990_v46 = vmul.f32 %v971_v51, %v3113_v24  ;;  %v996_v53 = vsub.f32 %v988_v59, %v3125_v7  ;;  %v1172_v32 = vand.u32 15, %v1164_v58 }
  0xf3   : > { %v3200_v45 = vld.sshfl [vmem:[#allocation1] sm:$0xff pattern:$0x75316420]  ;;  %v3202_v49 = vld.sshfl [vmem:[#allocation1 + $0x8] sm:$0xff pattern:$0x75316420]  ;;  %v1084_v57 = vsel %vm520_vm4, %v1079_v47, %v1063_v30  ;;  %v991_v3 = vmul.f32 %v973_v54, %v3119_v40  ;;  %v1083_v1 = vsel %vm520_vm4, %v1063_v30, %v1079_v47  ;;  %v1178_v2 = vcvt.s32.f32 %v1170_v21 }
  0xf4   : > { %897 = vst [vmem:[#allocation1] ss:$2 sm:$0xff] %v881_v37  ;;  %v989_v37 = vmul.f32 %v970_v10, %v3110_v26  ;;  %v1085_v6 = vrot.slane %v1084_v57, 4  ;;  %v1173_v10 = vand.u32 15, %v1165_v38  ;;  %v1179_v4 = vcvt.s32.f32 %v1171_v11 }
  0xf5   : > { %v3208_v43 = vld.sshfl [vmem:[#allocation1 + $0x10] sm:$0xff pattern:$0x75316420]  ;;  %v3210_v5 = vld.sshfl [vmem:[#allocation1 + $0x18] sm:$0xff pattern:$0x75316420]  ;;  %v1180_v44 = vcvt.s32.f32 %v1172_v32  ;;  %v998_v30 = vsub.f32 %v990_v46, %v3132_v14  ;;  %v1103_v57 = vmul.f32 %v1083_v1, %v3101_v33 }
  0xf6   : > { %899 = vst [vmem:[#allocation1 + $0x1] ss:$2 sm:$0xff] %v882_v48  ;;  %v1086_v48 = vsel %vm520_vm4, %v1065_v36, %v1080_v0  ;;  %v1181_v59 = vcvt.s32.f32 %v1173_v10  ;;  %v1194_v41 = vrot.slane %v1179_v4, 4  ;;  %v1277_v58 = vshra.s32 %v3094_v61, 24 }
  0xf7   : > { %901 = vst [vmem:[#allocation1 + $0x10] ss:$2 sm:$0xff] %v883_v42  ;;  %v1087_v42 = vsel %vm520_vm4, %v1080_v0, %v1065_v36  ;;  %v999_v0 = vsub.f32 %v991_v3, %v3135_v39  ;;  %v3232_v36 = vmul.f32 %v1086_v48, %v3113_v24  ;;  %v1104_v32 = vmul.f32 %v1085_v6, %v3110_v26 }
  0xf8   : > { %903 = vst [vmem:[#allocation1 + $0x11] ss:$2 sm:$0xff] %v884_v52  ;;  %v997_v52 = vsub.f32 %v989_v37, %v3129_v16  ;;  %v1088_v51 = vrot.slane %v1087_v42, 4  ;;  %v1195_v47 = vrot.slane %v1181_v59, 4  ;;  %v1199_v38 = vsel %vm520_vm4, %v1194_v41, %v1178_v2 }
  0xf9   : > { %v1278_v37 = vshra.s32 %v3104_v50, 24  ;;  %v1198_v3 = vsel %vm520_vm4, %v1178_v2, %v1194_v41  ;;  %v1200_v1 = vrot.slane %v1199_v38, 4  ;;  %v1279_v48 = vshra.s32 %v3107_v34, 24  ;;  %v3258_v38 = vld.sshfl [vmem:[#allocation1 + $0x20] sm:$0xff pattern:$0x75316420] }
  0xfa   : > { %v3242_v46 = vmul.f32 %v1088_v51, %v3119_v40  ;;  %v1111_v42 = vsub.f32 %v1103_v57, %v3125_v7  ;;  %v1201_v6 = vsel %vm520_vm4, %v1180_v44, %v1195_v47  ;;  %v1280_v10 = vshra.s32 %v3116_v17, 24  ;;  %3582 = vst [vmem:[#allocation43_spill] sm:$0xff] %v3258_v38 }
  0xfb   : > { %v1112_v4 = vsub.f32 %v1104_v32, %v3129_v16  ;;  %v1285_v51 = vand.u32 15, %v1277_v58  ;;  %v1286_v2 = vand.u32 15, %v1278_v37  ;;  %v1287_v32 = vand.u32 15, %v1279_v48  ;;  %v3266_v58 = vld.sshfl [vmem:[#allocation1 + $0x28] sm:$0xff pattern:$0x75316420] }
  0xfc   : > { %v1114_v59 = vsub.f32 %v3242_v46, %v3135_v39  ;;  %v1288_v57 = vand.u32 15, %v1280_v10  ;;  %3583 = vst [vmem:[#allocation44_spill] sm:$0xff] %v3266_v58  ;;  %v2000_v46 = vshrl.u32 %v3094_v61, 28  ;;  %v2002_v10 = vshrl.u32 %v3107_v34, 28 }
  0xfd   : > { %v3224_v31 = vld.sshfl [vmem:[#allocation1] sm:$0xff pattern:$0x75316420]  ;;  %v3226_v54 = vld.sshfl [vmem:[#allocation1 + $0x8] sm:$0xff pattern:$0x75316420] }
  0xfe   : > { %1012 = vst [vmem:[#allocation1] ss:$2 sm:$0xff] %v996_v53  ;;  %v1202_v53 = vsel %vm520_vm4, %v1195_v47, %v1180_v44  ;;  %v3261_v44 = vmul.f32 %v1200_v1, %v3110_v26  ;;  %v1293_v47 = vcvt.s32.f32 %v1285_v51  ;;  %v1296_v37 = vcvt.s32.f32 %v1288_v57 }
  0xff   : > { %v3237_v21 = vld.sshfl [vmem:[#allocation1 + $0x10] sm:$0xff pattern:$0x75316420]  ;;  %v3239_v11 = vld.sshfl [vmem:[#allocation1 + $0x18] sm:$0xff pattern:$0x75316420]  ;;  %v1575_v1 = vunpack.c.l.b16 %v3000_v60  ;;  %v1577_v57 = vunpack.c.l.b16 %v3005_v25 }
 0x100   : > { %1014 = vst [vmem:[#allocation1 + $0x1] ss:$2 sm:$0xff] %v997_v52  ;;  %v1113_v52 = vsub.f32 %v3232_v36, %v3132_v14  ;;  %v1203_v41 = vrot.slane %v1202_v53, 4  ;;  %v1294_v36 = vcvt.s32.f32 %v1286_v2  ;;  %v2003_v38 = vshrl.u32 %v3116_v17, 28 }
 0x101   : > { %1016 = vst [vmem:[#allocation1 + $0x10] ss:$2 sm:$0xff] %v998_v30  ;;  %v3256_v30 = vmul.f32 %v1198_v3, %v3101_v33  ;;  %v2001_v3 = vshrl.u32 %v3104_v50, 28  ;;  %v1295_v17 = vcvt.s32.f32 %v1287_v32  ;;  %v1581_v23 = vpack.c.b16 %v1577_v57, %v1575_v1 }
 0x102   : > { %1018 = vst [vmem:[#allocation1 + $0x11] ss:$2 sm:$0xff] %v999_v0  ;;  %v3264_v0 = vmul.f32 %v1201_v6, %v3113_v24  ;;  %v1309_v53 = vrot.slane %v1294_v36, 4  ;;  %v3584_v6 = vsub.f32 %v3043_v27, %v2877_v12  ;;  %v3277_v51 = vmul.f32 %v1203_v41, %v3119_v40 }
 0x103   : > { %v1226_v61 = vsub.f32 %v3256_v30, %v3125_v7  ;;  %v1409_v50 = vcvt.s32.f32 %v2001_v3  ;;  %v1310_v12 = vrot.slane %v1296_v37, 4  ;;  %v1227_v41 = vsub.f32 %v3261_v44, %v3129_v16  ;;  %1677 = vmatpush.bf16.msra.mxu0 %v1581_v23 }
 0x104   : > { %1480 = vst [vmem:[#allocation1 + $0x20] ss:$2 sm:$0xff] %v3584_v6  ;;  %v1228_v60 = vsub.f32 %v3264_v0, %v3132_v14  ;;  %v1408_v6 = vcvt.s32.f32 %v2000_v46  ;;  %v1411_v58 = vcvt.s32.f32 %v2003_v38  ;;  %v1313_v25 = vsel %vm520_vm4, %v1293_v47, %v1309_v53 }
 0x105   : > { %v1314_v3 = vsel %vm520_vm4, %v1309_v53, %v1293_v47  ;;  %v1229_v32 = vsub.f32 %v3277_v51, %v3135_v39  ;;  %v1424_v37 = vrot.slane %v1409_v50, 4  ;;  %v3298_v38 = vpack.c.bf16 %v2973_v56, %v2971_v55 }
 0x106   : > { %v1317_v44 = vsel %vm520_vm4, %v1310_v12, %v1295_v17  ;;  %v1425_v47 = vrot.slane %v1411_v58, 4  ;;  %v1315_v53 = vrot.slane %v1314_v3, 4  ;;  %v3307_v23 = vmul.f32 %v1313_v25, %v3101_v33 }
 0x107   : > { %v1027_v48 = vld.sshfl [vmem:[#allocation1] sm:$0xff pattern:$0x75316420]  ;;  %v1028_v2 = vld.sshfl [vmem:[#allocation1 + $0x8] sm:$0xff pattern:$0x75316420]  ;;  %v1429_v55 = vsel %vm520_vm4, %v1424_v37, %v1408_v6  ;;  %v3585_v56 = vsub.f32 %v3061_v35, %v2880_v13  ;;  %v3586_v1 = vsub.f32 %v3046_v29, %v2885_v19  ;;  %v3587_v13 = vsub.f32 %v3064_v28, %v2888_v20 }
 0x108   : > { %v3282_v34 = vpack.c.bf16 %v1028_v2, %v1027_v48  ;;  %1127 = vst [vmem:[#allocation1] ss:$2 sm:$0xff] %v1111_v42  ;;  %v1410_v42 = vcvt.s32.f32 %v2002_v10  ;;  %v3290_v48 = vld.sshfl [vmem:[#allocation1 + $0x30] sm:$0xff pattern:$0x75316420]  ;;  %v1428_v10 = vsel %vm520_vm4, %v1408_v6, %v1424_v37  ;;  %v1318_v51 = vrot.slane %v1317_v44, 4 }
 0x109   : > { %v1029_v27 = vld.sshfl [vmem:[#allocation1 + $0x10] sm:$0xff pattern:$0x75316420]  ;;  %v1030_v36 = vld.sshfl [vmem:[#allocation1 + $0x18] sm:$0xff pattern:$0x75316420]  ;;  %v3321_v57 = vmul.f32 %v1428_v10, %v3101_v33  ;;  %v928_v37 = vpack.c.bf16 %v3226_v54, %v3224_v31  ;;  %v1341_v54 = vsub.f32 %v3307_v23, %v3125_v7  ;;  %v815_v23 = vpack.c.bf16 %v2948_v63, %v2946_v62 }
 0x10a   : > { %v1044_v30 = vpack.c.bf16 %v1030_v36, %v1029_v27  ;;  %1129 = vst [vmem:[#allocation1 + $0x1] ss:$2 sm:$0xff] %v1112_v4  ;;  %v3294_v2 = vld.sshfl [vmem:[#allocation1 + $0x38] sm:$0xff pattern:$0x75316420]  ;;  %v3302_v4 = vpack.c.bf16 %v2981_v9, %v2979_v8  ;;  %v1316_v8 = vsel %vm520_vm4, %v1295_v17, %v1310_v12  ;;  %v1430_v9 = vrot.slane %v1429_v55, 4 }
 0x10b   : > { %1131 = vst [vmem:[#allocation1 + $0x10] ss:$2 sm:$0xff] %v1113_v52  ;;  %v1572_v52 = vunpack.c.h.b16 %v3282_v34  ;;  %v1432_v58 = vsel %vm520_vm4, %v1425_v47, %v1410_v42  ;;  %v1556_v12 = vunpack.c.h.b16 %v3298_v38  ;;  %v1456_v6 = vsub.f32 %v3321_v57, %v3125_v7 }
 0x10c   : > { %1133 = vst [vmem:[#allocation1 + $0x11] ss:$2 sm:$0xff] %v1114_v59  ;;  %v1574_v46 = vunpack.c.h.b16 %v1044_v30  ;;  %v1431_v59 = vsel %vm520_vm4, %v1410_v42, %v1425_v47  ;;  %v1433_v50 = vrot.slane %v1432_v58, 4  ;;  %v3330_v35 = vmul.f32 %v1430_v9, %v3110_v26 }
 0x10d   : > { %1482 = vst [vmem:[#allocation1 + $0x21] ss:$2 sm:$0xff] %v3585_v56  ;;  %v3324_v27 = vmul.f32 %v1431_v59, %v3113_v24  ;;  %v1558_v19 = vunpack.c.h.b16 %v3302_v4  ;;  %v1571_v28 = vunpack.c.l.b16 %v3282_v34  ;;  %v1573_v42 = vunpack.c.l.b16 %v1044_v30 }
 0x10e   : > { %1484 = vst [vmem:[#allocation1 + $0x30] ss:$2 sm:$0xff] %v3586_v1  ;;  %v1580_v17 = vpack.c.b16 %v1574_v46, %v1572_v52  ;;  %v3339_v33 = vmul.f32 %v1433_v50, %v3119_v40  ;;  %v1457_v25 = vsub.f32 %v3330_v35, %v3129_v16  ;;  %v929_v34 = vpack.c.bf16 %v3239_v11, %v3237_v21 }
 0x10f   : > { %1486 = vst [vmem:[#allocation1 + $0x31] ss:$2 sm:$0xff] %v3587_v13  ;;  %v1458_v20 = vsub.f32 %v3324_v27, %v3132_v14  ;;  %v1562_v3 = vpack.c.b16 %v1558_v19, %v1556_v12  ;;  %v1579_v46 = vpack.c.b16 %v1573_v42, %v1571_v28  ;;  %v1552_v10 = vunpack.c.h.b16 %v928_v37 }
 0x110   : > { %1706 = vmatpush.bf16.msra.mxu2 %v1580_v17  ;;  %v1459_v52 = vsub.f32 %v3339_v33, %v3135_v39  ;;  %v1335_v31 = vmul.f32 %v1316_v8, %v3113_v24  ;;  %v1554_v55 = vunpack.c.h.b16 %v929_v34  ;;  %v1334_v56 = vmul.f32 %v1315_v53, %v3110_v26 }
 0x111   : > { %v3334_v29 = vld.sshfl [vmem:[#allocation1] sm:$0xff pattern:$0x75316420]  ;;  %v3336_v36 = vld.sshfl [vmem:[#allocation1 + $0x8] sm:$0xff pattern:$0x75316420]  ;;  %1678 = vmatpush.bf16.msra.mxu0 %v1579_v46  ;;  %v1555_v11 = vunpack.c.l.b16 %v3298_v38  ;;  %v1336_v0 = vmul.f32 %v1318_v51, %v3119_v40  ;;  %v1536_v58 = vunpack.c.h.b16 %v815_v23  ;;  %v813_v19 = vpack.c.bf16 %v3202_v49, %v3200_v45 }
 0x112   : > { %1242 = vst [vmem:[#allocation1] ss:$2 sm:$0xff] %v1226_v61  ;;  %v1560_v24 = vpack.c.b16 %v1554_v55, %v1552_v10  ;;  %v1342_v38 = vsub.f32 %v1334_v56, %v3129_v16  ;;  %v1343_v62 = vsub.f32 %v1335_v31, %v3132_v14  ;;  %v3588_v49 = vld [vmem:[#allocation28_spill] sm:$0xff]  ;;  %v1391_v14 = vpack.c.bf16 %v3294_v2, %v3290_v48  ;;  %v3597_v2 = vld [vmem:[#allocation35_spill] sm:$0xff] }
 0x113   : > { %v3350_v44 = vld.sshfl [vmem:[#allocation1 + $0x10] sm:$0xff pattern:$0x75316420]  ;;  %v3352_v47 = vld.sshfl [vmem:[#allocation1 + $0x18] sm:$0xff pattern:$0x75316420]  ;;  %v1344_v13 = vsub.f32 %v1336_v0, %v3135_v39  ;;  %v700_v45 = vpack.c.bf16 %v3588_v49, %v2918_v22 }
 0x114   : > { %1244 = vst [vmem:[#allocation1 + $0x1] ss:$2 sm:$0xff] %v1227_v41  ;;  %v1491_v61 = vld.sshfl [vmem:[#allocation1 + $0x20] sm:$0xff pattern:$0x75316420]  ;;  %1707 = vmatpush.bf16.msra.mxu2 %v1562_v3  ;;  %v1557_v41 = vunpack.c.l.b16 %v3302_v4 }
 0x115   : > { %1246 = vst [vmem:[#allocation1 + $0x10] ss:$2 sm:$0xff] %v1228_v60  ;;  %v1492_v30 = vld.sshfl [vmem:[#allocation1 + $0x28] sm:$0xff pattern:$0x75316420] }
 0x116   : > { %1248 = vst [vmem:[#allocation1 + $0x11] ss:$2 sm:$0xff] %v1229_v32  ;;  %v1493_v9 = vld.sshfl [vmem:[#allocation1 + $0x30] sm:$0xff pattern:$0x75316420]  ;;  %v1505_v21 = vpack.c.bf16 %v1492_v30, %v1491_v61  ;;  %v816_v32 = vpack.c.bf16 %v2956_v18, %v2954_v15  ;;  %v1561_v59 = vpack.c.b16 %v1557_v41, %v1555_v11  ;;  %v1551_v15 = vunpack.c.l.b16 %v928_v37  ;;  %v3590_v30 = vld [vmem:[#allocation30_spill] sm:$0xff] }
 0x117   : > { %v1494_v60 = vld.sshfl [vmem:[#allocation1 + $0x38] sm:$0xff pattern:$0x75316420]  ;;  %v1553_v18 = vunpack.c.l.b16 %v929_v34  ;;  %v814_v61 = vpack.c.bf16 %v3210_v5, %v3208_v43  ;;  %v1532_v37 = vunpack.c.h.b16 %v813_v19  ;;  %v1535_v34 = vunpack.c.l.b16 %v815_v23  ;;  %v3591_v0 = vld [vmem:[#allocation39_spill] sm:$0xff] }
 0x118   : > { %v1506_v8 = vpack.c.bf16 %v1494_v60, %v1493_v9  ;;  %v1655_v26 = vunpack.c.l.b16 %v1505_v21  ;;  %v1656_v53 = vunpack.c.h.b16 %v1505_v21  ;;  %v1538_v1 = vunpack.c.h.b16 %v816_v32  ;;  %1708 = vmatpush.bf16.msra.mxu2 %v1560_v24  ;;  %1679 = vmatpush.bf16.msra.mxu0 %v1561_v59  ;;  %v3592_v60 = vld [vmem:[#allocation40_spill] sm:$0xff] }
 0x119   : > { %v1559_v42 = vpack.c.b16 %v1553_v18, %v1551_v15  ;;  %v1537_v46 = vunpack.c.l.b16 %v816_v32  ;;  %v1534_v10 = vunpack.c.h.b16 %v814_v61  ;;  %v1516_v43 = vunpack.c.h.b16 %v700_v45  ;;  %v3593_v32 = vld [vmem:[#allocation41_spill] sm:$0xff] }
 0x11a   : > { %v1657_v50 = vunpack.c.l.b16 %v1506_v8  ;;  %v1658_v4 = vunpack.c.h.b16 %v1506_v8  ;;  %v1542_v63 = vpack.c.b16 %v1538_v1, %v1536_v58  ;;  %v1531_v9 = vunpack.c.l.b16 %v813_v19  ;;  %v3594_v8 = vld [vmem:[#allocation42_spill] sm:$0xff] }
 0x11b   : > { %v3373_v40 = vld.sshfl [vmem:[#allocation1] sm:$0xff pattern:$0x75316420]  ;;  %v3375_v51 = vld.sshfl [vmem:[#allocation1 + $0x8] sm:$0xff pattern:$0x75316420]  ;;  %v1541_v31 = vpack.c.b16 %v1537_v46, %v1535_v34  ;;  %v1540_v56 = vpack.c.b16 %v1534_v10, %v1532_v37  ;;  %v1533_v21 = vunpack.c.l.b16 %v814_v61  ;;  %v698_v24 = vpack.c.bf16 %v3592_v60, %v3591_v0 }
 0x11c   : > { %1357 = vst [vmem:[#allocation1] ss:$2 sm:$0xff] %v1341_v54  ;;  %v1661_v17 = vpack.c.b16 %v1657_v50, %v1655_v26  ;;  %v1662_v12 = vpack.c.b16 %v1658_v4, %v1656_v53  ;;  %1709 = vmatpush.bf16.msra.mxu2 %v1542_v63  ;;  %1680 = vmatpush.bf16.msra.mxu0 %v1559_v42  ;;  %v3589_v54 = vld [vmem:[#allocation29_spill] sm:$0xff]  ;;  %v1515_v59 = vunpack.c.l.b16 %v700_v45  ;;  %v1637_v42 = vunpack.c.l.b16 %v1391_v14 }
 0x11d   : > { %v3381_v28 = vld.sshfl [vmem:[#allocation1 + $0x10] sm:$0xff pattern:$0x75316420]  ;;  %v3383_v3 = vld.sshfl [vmem:[#allocation1 + $0x18] sm:$0xff pattern:$0x75316420]  ;;  %v701_v55 = vpack.c.bf16 %v3590_v30, %v3589_v54  ;;  %v1539_v41 = vpack.c.b16 %v1533_v21, %v1531_v9  ;;  %v699_v26 = vpack.c.bf16 %v3594_v8, %v3593_v32  ;;  %v1512_v53 = vunpack.c.h.b16 %v698_v24 }
 0x11e   : > { %1359 = vst [vmem:[#allocation1 + $0x1] ss:$2 sm:$0xff] %v1342_v38  ;;  %1691 = vmatpush.bf16.msra.mxu1 %v1661_v17  ;;  %1719 = vmatpush.bf16.msra.mxu3 %v1662_v12  ;;  %v1669_v63 = vld [vmem:[%s2776_s29 + $0x10] sm:$0xff]  ;;  %v1638_v37 = vunpack.c.h.b16 %v1391_v14  ;;  %v3598_v30 = vld [vmem:[#allocation36_spill] sm:$0xff]  ;;  %v1273_v0 = vpack.c.bf16 %v3375_v51, %v3373_v40  ;;  %v1274_v60 = vpack.c.bf16 %v3383_v3, %v3381_v28 }
 0x11f   : > { %1361 = vst [vmem:[#allocation1 + $0x10] ss:$2 sm:$0xff] %v1343_v62  ;;  %v1518_v5 = vunpack.c.h.b16 %v701_v55  ;;  %v1517_v58 = vunpack.c.l.b16 %v701_v55  ;;  %v1514_v50 = vunpack.c.h.b16 %v699_v26  ;;  %v1667_v62 = vld [vmem:[%s2776_s29] sm:$0xff]  ;;  %v1513_v15 = vunpack.c.l.b16 %v699_v26 }
 0x120   : > { %1363 = vst [vmem:[#allocation1 + $0x11] ss:$2 sm:$0xff] %v1344_v13  ;;  %1710 = vmatpush.bf16.msra.mxu2 %v1540_v56  ;;  %1681 = vmatpush.bf16.msra.mxu0 %v1541_v31  ;;  %v1671_v57 = vpack.c.bf16 %v1669_v63, %v1667_v62  ;;  %v3596_v13 = vld [vmem:[#allocation44_spill] sm:$0xff]  ;;  %v1275_v55 = vpack.c.bf16 %v3598_v30, %v3597_v2  ;;  %v3599_v56 = vld [vmem:[#allocation37_spill] sm:$0xff]  ;;  %v1612_v28 = vunpack.c.h.b16 %v1273_v0  ;;  %v1614_v3 = vunpack.c.h.b16 %v1274_v60 }
 0x121   : > { %v1522_v11 = vpack.c.b16 %v1518_v5, %v1516_v43  ;;  %v1521_v4 = vpack.c.b16 %v1517_v58, %v1515_v59  ;;  %v1520_v7 = vpack.c.b16 %v1514_v50, %v1512_v53  ;;  %v3600_v43 = vld [vmem:[#allocation38_spill] sm:$0xff]  ;;  %v1611_v53 = vunpack.c.l.b16 %v1273_v0  ;;  %v3601_v58 = vld [vmem:[#allocation31_spill] sm:$0xff]  ;;  %v3603_v50 = vld [vmem:[#allocation33_spill] sm:$0xff] }
 0x122   : > { %v1276_v5 = vpack.c.bf16 %v3600_v43, %v3599_v56  ;;  %v1613_v59 = vunpack.c.l.b16 %v1274_v60  ;;  %v1676_v30 = vld [vmem:[#allocation2 + $0x8] sm:$0xff] }
 0x124   : > { %1711 = vmatpush.bf16.msra.mxu2 %v1522_v11  ;;  %1682 = vmatpush.bf16.msra.mxu0 %v1539_v41  ;;  %v1617_v8 = vunpack.c.l.b16 %v1276_v5  ;;  %v1618_v26 = vunpack.c.h.b16 %v1276_v5  ;;  %v1619_v63 = vpack.c.b16 %v1613_v59, %v1611_v53 }
 0x125   : > { %v1372_v22 = vld.sshfl [vmem:[#allocation1] sm:$0xff pattern:$0x75316420]  ;;  %v1373_v23 = vld.sshfl [vmem:[#allocation1 + $0x8] sm:$0xff pattern:$0x75316420] }
 0x126   : > { %1472 = vst [vmem:[#allocation1] ss:$2 sm:$0xff] %v1456_v6  ;;  %v1511_v6 = vunpack.c.l.b16 %v698_v24  ;;  %v1388_v10 = vpack.c.bf16 %v1373_v23, %v1372_v22  ;;  %v1615_v24 = vunpack.c.l.b16 %v1275_v55  ;;  %v1616_v22 = vunpack.c.h.b16 %v1275_v55 }
 0x127   : > { %v1374_v1 = vld.sshfl [vmem:[#allocation1 + $0x10] sm:$0xff pattern:$0x75316420]  ;;  %v1375_v38 = vld.sshfl [vmem:[#allocation1 + $0x18] sm:$0xff pattern:$0x75316420] }
 0x128   : > { %1474 = vst [vmem:[#allocation1 + $0x1] ss:$2 sm:$0xff] %v1457_v25  ;;  %1712 = vmatpush.bf16.msra.mxu2 %v1520_v7  ;;  %1683 = vmatpush.bf16.msra.mxu0 %v1521_v4  ;;  %v1519_v18 = vpack.c.b16 %v1513_v15, %v1511_v6  ;;  %v3595_v25 = vld [vmem:[#allocation43_spill] sm:$0xff]  ;;  %v1389_v49 = vpack.c.bf16 %v1375_v38, %v1374_v1  ;;  %v1631_v9 = vunpack.c.l.b16 %v1388_v10  ;;  %v1632_v11 = vunpack.c.h.b16 %v1388_v10  ;;  %v3602_v1 = vld [vmem:[#allocation32_spill] sm:$0xff]  ;;  %v3604_v4 = vld [vmem:[#allocation34_spill] sm:$0xff] }
 0x129   : > { %1476 = vst [vmem:[#allocation1 + $0x10] ss:$2 sm:$0xff] %v1458_v20  ;;  %v1390_v17 = vpack.c.bf16 %v3596_v13, %v3595_v25  ;;  %v1160_v38 = vpack.c.bf16 %v3602_v1, %v3601_v58  ;;  %v1161_v62 = vpack.c.bf16 %v3604_v4, %v3603_v50  ;;  %v1621_v40 = vpack.c.b16 %v1617_v8, %v1615_v24 }
 0x12a   : > { %1478 = vst [vmem:[#allocation1 + $0x11] ss:$2 sm:$0xff] %v1459_v52  ;;  %v1633_v21 = vunpack.c.l.b16 %v1389_v49  ;;  %v1634_v41 = vunpack.c.h.b16 %v1389_v49  ;;  %v1622_v51 = vpack.c.b16 %v1618_v26, %v1616_v22  ;;  %v1675_v49 = vld [vmem:[#allocation2 + $0x18] sm:$0xff] }
 0x12b   : > { %1713 = vmatmul.bf16.vlgmr.msra.gmra.mxu2 %v1671_v57  ;;  %v1635_v19 = vunpack.c.l.b16 %v1390_v17  ;;  %v1636_v61 = vunpack.c.h.b16 %v1390_v17  ;;  %v1595_v7 = vunpack.c.l.b16 %v1160_v38  ;;  %v1596_v6 = vunpack.c.h.b16 %v1160_v38 }
 0x12c   : > { %1684 = vmatpush.bf16.msra.mxu0 %v1519_v18  ;;  %v1639_v23 = vpack.c.b16 %v1633_v21, %v1631_v9  ;;  %v1640_v32 = vpack.c.b16 %v1634_v41, %v1632_v11  ;;  %v1598_v15 = vunpack.c.h.b16 %v1161_v62  ;;  %v1620_v18 = vpack.c.b16 %v1614_v3, %v1612_v28 }
 0x12d   : > { %v1641_v54 = vpack.c.b16 %v1637_v42, %v1635_v19  ;;  %v1642_v48 = vpack.c.b16 %v1638_v37, %v1636_v61  ;;  %v1674_v37 = vld [vmem:[#allocation2] sm:$0xff] }
 0x12e   : > { %v1602_v13 = vpack.c.b16 %v1598_v15, %v1596_v6 }
 0x12f   : > { %v1487_v16 = vld.sshfl [vmem:[#allocation1] sm:$0xff pattern:$0x75316420]  ;;  %v1488_v35 = vld.sshfl [vmem:[#allocation1 + $0x8] sm:$0xff pattern:$0x75316420]  ;;  %1685 = vmatmul.bf16.vlgmr.msra.gmra.mxu0 %v1671_v57  ;;  %v1597_v57 = vunpack.c.l.b16 %v1161_v62 }
 0x130   : > { %v1503_v27 = vpack.c.bf16 %v1488_v35, %v1487_v16  ;;  %v1158_v16 = vpack.c.bf16 %v3336_v36, %v3334_v29  ;;  %v1159_v35 = vpack.c.bf16 %v3352_v47, %v3350_v44  ;;  %v1673_v36 = vld [vmem:[#allocation2 + $0x10] sm:$0xff] }
 0x131   : > { %v1489_v20 = vld.sshfl [vmem:[#allocation1 + $0x10] sm:$0xff pattern:$0x75316420]  ;;  %v1490_v39 = vld.sshfl [vmem:[#allocation1 + $0x18] sm:$0xff pattern:$0x75316420]  ;;  %v1601_v25 = vpack.c.b16 %v1597_v57, %v1595_v7 }
 0x132   : > { %v1504_v33 = vpack.c.bf16 %v1490_v39, %v1489_v20  ;;  %v1651_v52 = vunpack.c.l.b16 %v1503_v27  ;;  %v1652_v12 = vunpack.c.h.b16 %v1503_v27  ;;  %v1591_v17 = vunpack.c.l.b16 %v1158_v16 }
 0x133   : > { %v1593_v14 = vunpack.c.l.b16 %v1159_v35  ;;  %v1592_v27 = vunpack.c.h.b16 %v1158_v16  ;;  %v1594_v20 = vunpack.c.h.b16 %v1159_v35 }
 0x134   : > { %v1653_v34 = vunpack.c.l.b16 %v1504_v33  ;;  %v1654_v46 = vunpack.c.h.b16 %v1504_v33 }
 0x135   : > { %v1599_v39 = vpack.c.b16 %v1593_v14, %v1591_v17  ;;  %v1600_v33 = vpack.c.b16 %v1594_v20, %v1592_v27 }
 0x136   : > { %v1659_v45 = vpack.c.b16 %v1653_v34, %v1651_v52  ;;  %v1660_v31 = vpack.c.b16 %v1654_v46, %v1652_v12  ;;  %v1668_v52 = vld [vmem:[%s2776_s29 + $0x8] sm:$0xff]  ;;  %v1670_v12 = vld [vmem:[%s2776_s29 + $0x18] sm:$0xff]  ;;  %s3605_s29 = sld [smem:[#allocation21_spill]] }
 0x137   : > { %v1672_v19 = vpack.c.bf16 %v1670_v12, %v1668_v52 }
 0x138   : > { %1692 = vmatpush.bf16.msra.mxu1 %v1659_v45  ;;  %1720 = vmatpush.bf16.msra.mxu3 %v1660_v31 }
 0x13c   : > { %1693 = vmatpush.bf16.msra.mxu1 %v1641_v54  ;;  %1721 = vmatpush.bf16.msra.mxu3 %v1642_v48  ;;  %p2008_p10 = scmp.ne.s32.totalorder %s3605_s29, 1 }
 0x140   : > { %1694 = vmatpush.bf16.msra.mxu1 %v1639_v23  ;;  %1722 = vmatpush.bf16.msra.mxu3 %v1640_v32 }
 0x144   : > { %1695 = vmatpush.bf16.msra.mxu1 %v1621_v40  ;;  %1723 = vmatpush.bf16.msra.mxu3 %v1622_v51 }
 0x148   : > { %1696 = vmatpush.bf16.msra.mxu1 %v1619_v63  ;;  %1724 = vmatpush.bf16.msra.mxu3 %v1620_v18 }
 0x14c   : > { %1697 = vmatpush.bf16.msra.mxu1 %v1601_v25  ;;  %1725 = vmatpush.bf16.msra.mxu3 %v1602_v13 }
 0x150   : > { %1698 = vmatpush.bf16.msra.mxu1 %v1599_v39  ;;  %1726 = vmatpush.bf16.msra.mxu3 %v1600_v33 }
 0x153   : > { %1699 = vmatmul.bf16.vlgmr.msra.gmra.mxu1 %v1672_v19  ;;  %1727 = vmatmul.bf16.vlgmr.msra.gmra.mxu3 %v1672_v19 }
 0x1ac   : > { %v1686_v29 = vpop.f32.mrf.mxu0 }
 0x1ae   : > { %v1714_v61 = vpop.f32.mrf.mxu2 }
 0x1b4   : > { %v1688_v10 = vpop.f32.mrf.mxu0 }
 0x1b6   : > { %v1716_v2 = vpop.f32.mrf.mxu2 }
 0x1d0   : > { %v1700_v44 = vpop.f32.mrf.mxu1 }
 0x1d1   : > { %v1701_v47 = vadd.f32 %v1700_v44, %v1686_v29 }
 0x1d3   : > { %v1733_v42 = vadd.f32 %v1701_v47, %v1673_v36 }
 0x1d5   : > { %1737 = vst [vmem:[#allocation2 + $0x10] sm:$0xff] %v1733_v42 }
 0x1d6   : > { %v1728_v34 = vpop.f32.mrf.mxu3 }
 0x1d7   : > { %v1729_v46 = vadd.f32 %v1728_v34, %v1714_v61 }
 0x1d8   : > { %v1702_v45 = vpop.f32.mrf.mxu1 }
 0x1d9   : > { %v1734_v31 = vadd.f32 %v1729_v46, %v1674_v37  ;;  %v1703_v54 = vadd.f32 %v1702_v45, %v1688_v10 }
 0x1db   : > { %1738 = vst [vmem:[#allocation2] sm:$0xff] %v1734_v31  ;;  %v1735_v48 = vadd.f32 %v1703_v54, %v1675_v49 }
 0x1dd   : > { %1739 = vst [vmem:[#allocation2 + $0x18] sm:$0xff] %v1735_v48 }
 0x1de   : > { %v1730_v55 = vpop.f32.mrf.mxu3 }
 0x1df   : > { %v1731_v56 = vadd.f32 %v1730_v55, %v1716_v2  ;;  %1744 = sbr.rel (%p2008_p10) target bundleno = 494 (0x1ee), region = 68 }
 0x1e1   : > { %v1736_v43 = vadd.f32 %v1731_v56, %v1676_v30 }
 0x1e3   : > { %1740 = vst [vmem:[#allocation2 + $0x8] sm:$0xff] %v1736_v43 }
 0x1e4   : > { %v1745_v5 = vld [vmem:[#allocation2 + $0x10] sm:$0xff]  ;;  %v1749_v9 = vld [vmem:[%s2802_s0] sm:$0x3]  ;;  %v1747_v0 = vld [vmem:[#allocation2 + $0x18] sm:$0xff] }
 0x1e5   : > { %v1746_v21 = vld [vmem:[#allocation2] sm:$0xff]  ;;  %v1751_v11 = vperm.slane %v1749_v9, 0  ;;  %v1752_v41 = vperm.slane %v1749_v9, 1 }
 0x1e7   : > { %v1755_v24 = vadd.f32 %v1751_v11, %v1745_v5  ;;  %v1756_v22 = vadd.f32 %v1752_v41, %v1746_v21  ;;  %v1757_v23 = vadd.f32 %v1751_v11, %v1747_v0 }
 0x1e9   : > { %1759 = vst [vmem:[%s2809_s24] sm:$0xff] %v1755_v24 }
 0x1ea   : > { %v1748_v60 = vld [vmem:[#allocation2 + $0x8] sm:$0xff]  ;;  %1760 = vst [vmem:[%s2809_s24 + $0x8] sm:$0xff] %v1756_v22 }
 0x1eb   : > { %v1758_v32 = vadd.f32 %v1752_v41, %v1748_v60  ;;  %1761 = vst [vmem:[%s2809_s24 + $0x10] sm:$0xff] %v1757_v23 }
 0x1ed   : > { %1762 = vst [vmem:[%s2809_s24 + $0x18] sm:$0xff] %v1758_v32 }
 0x1ee PF: > { %s3606_s13 = sld [smem:[#allocation22_spill]]  ;;  %s1779_s1 = sshll.u32 %s2809_s24, 4  ;;  %s1780_s1 = int_to_ptr.vmem [resolvable:$true] %s1779_s1 }
 0x1ef   : > { %s3607_s16 = sld [smem:[#allocation50_spill]]  ;;  %s1764_s17 = scalar_lea.sflag [#allocation5], %s2799_s14 }
 0x1f4   : > { %s2016_s5 = sshll.u32 %s3606_s13, 4 }
 0x1f5   : > { %s1778_s21 = scalar_lea.hbm %s3607_s16, %s2016_s5  ;;  %s2340_s30 = scalar_lea.hbm %s3607_s16, 64 }
 0x1f6   : > { %s1781_s2 = sshll.u32 %s1778_s21, 4  ;;  %s1782_s2 = int_to_ptr.hbm [resolvable:$true] %s1781_s2 }
 0x1f7   : > { %s2334_s7 = sshra.s32 %s1782_s2, 4  ;;  %s2335_s7 = int_to_ptr.hbm [resolvable:$true] %s2334_s7 }
 0x1f8   : > { %s2336_s8 = scalar_lea.hbm %s2335_s7, 32  ;;  %p2341_p9 = scmp.lt.s32.totalorder %s2335_s7, %s3607_s16 }
 0x1f9   : > { %p2337_p4 = scmp.ne.s32.totalorder %s2335_s7, %s2336_s8  ;;  %p2342_p12 = scmp.lt.s32.totalorder %s2340_s30, %s2336_s8 }
 0x1fb   : > { %p2338_p7 = pnand %p2337_p4, %p2756_p2  ;;  %p2343_p13 = por %p2342_p12, %p2341_p9 }
 0x1fd   : > { %p2339_p8 = pneg %p2338_p7 }
 0x1ff   : > { %p2344_p5 = pnand %p2343_p13, %p2339_p8 }
 0x201   : > { %2347 = shalt.err (!%p2344_p5)
}
 0x202   : > { %s2484_s14 = smov 256   ;;  %s2485_s24 = smov 512  }
 0x203   : > { %s2486_s3 = smov 16  }
 0x204   : > { %2027 = dma.vmem_to_hbm [thread:$0]  (%p2756_p2), %s1780_s1, 512, %s1782_s2, %s1764_s17, %s2484_s14, %s2485_s24, %s2486_s3  }
 0x205 PF: > { %s3608_s29 = sld [smem:[#allocation18_spill]]  ;;  %p2050_p1 = scmp.ge.s32.totalorder %s2478_s6, 2 }
 0x207   : > { %p2046_p0 = pnand %p2050_p1, %p2760_p11 }
 0x209   : > { %p2047_p3 = pneg %p2046_p0 }
 0x20b   : > { %s1796_s13 = sand.u32 1, %s3608_s29  }
 0x20c   : > { %s1797_s5 = scalar_lea.sflag [#allocation5], %s1796_s13 }
 0x20d   : > { %2421 = dma.done.wait (%p2047_p3), %s1797_s5, 512  }
 0x20e   : > { %2423 = vsyncadd (%p2047_p3), %s1797_s5, 4294966784  ;;  %s27_s6 = sadd.s32 1, %s2478_s6   ;;  %s3610_s10 = sld [smem:[#allocation20_spill]] }
 0x20f   : > { %p3458_p6 = scmp.ge.s32.totalorder %s27_s6, 6   ;;  %s3611_s27 = sld [smem:[#allocation23_spill]] }
 0x210   : > { %s3612_s1 = sld [smem:[#allocation24_spill]]  ;;  %s3615_s18 = smov %s2430_s19 }
 0x211   : > { %s3613_s29 = sld [smem:[#allocation25_spill]]  ;;  %s3616_s19 = smov %s2434_s20 }
 0x212   : > { %s3614_s30 = sld [smem:[#allocation27_spill]]  ;;  %s3617_s20 = smov %s2738_s11 }
 0x213   : > { %s3618_s21 = smov %s2442_s22  ;;  %s3620_s23 = smov %s3632_s9 }
 0x214   : > { %s3619_s22 = smov %s3610_s10  ;;  %s3621_s24 = smov %s2454_s25 }
 0x215   : > { %s3622_s25 = smov %s2458_s26  ;;  %s3623_s26 = smov %s2670_s28 }
 0x216   : > { %s3624_s28 = smov %s3612_s1  ;;  %26 = sbr.rel (!%p3458_p6) target bundleno = 21 (0x15), region = 197 }
 0x21b   :  { %1803 = vsyncpa [#allocation4], 1 }
 0x21c   :  { %1805 = vsyncpa [#allocation4 + $0x1], 1 }
 0x21d   :  { %1806 = vsyncpa [#allocation7], 1 }
 0x21e   :  { %1808 = vsyncpa [#allocation7 + $0x1], 1 }
 0x21f   :  { %1809 = vsyncpa [#allocation10], 1 }
 0x220   :  { %1811 = vsyncpa [#allocation10 + $0x1], 1 }
 0x221   :  { %1812 = vsyncpa [#allocation5], 1 }
 0x222   :  { %1814 = vsyncpa [#allocation5 + $0x1], 1 }

</bundles_post_ra>
